<compile_context>
chip_gen: v7x
topology: tpu7x:2x2x1
jax: 0.10.0
libtpu: 0.0.40
codegen_flags: <defaults>
</compile_context>

<pallas_src>
import functools

import jax
import jax.numpy as jnp
import numpy as np
from jax.experimental import pallas as pl
from jax.experimental.pallas import tpu as pltpu

# Model hyper-parameters (match the nn.Module constructor arguments).
VOCAB = 50
HIDDEN = 32          # hidden_dim
NUM_LAYERS = 2       # num_layers (kernel below is specialized to 2)
NUM_CLASSES = 3      # num_classes
EMBED = 32           # embed_dim
LANE = 128           # TPU lane width; logits are padded to this


# ----------------------------------------------------------------------------
# Fused Pallas kernel: 2-layer LSTM over both streams + classifier head
# ----------------------------------------------------------------------------
def _fused_unilstm_kernel(x_ref,                       # (T*BP, E)  flat time-major input
                          wih0_ref, whh0_ref, b0_ref,  # (E,4H) (H,4H) (1,4H)
                          wih1_ref, whh1_ref, b1_ref,  # (H,4H) (H,4H) (1,4H)
                          wi_ref, bi_ref,              # (2H,H) (1,H)   int_layer
                          wo_ref, bo_ref,              # (H,128) (1,128) out_layer (lane-padded)
                          out_ref,                     # (bs, 128) lane-padded logits
                          gx_sc,                       # (T*BP, 4H) VMEM scratch
                          hseq_sc,                     # (T*BP, H)  VMEM scratch
                          *, T, Tp, Th, bs):
    BP = 2 * bs
    H = whh0_ref.shape[0]

    # Row mask: rows [0, bs) are the premise stream, rows [bs, 2bs) hypothesis.
    row = jax.lax.broadcasted_iota(jnp.int32, (BP, 1), 0)
    prem_rows = (row < bs).astype(jnp.float32)

    def upd_mask(t):  # trace-time (t is a Python int; loop fully unrolled)
        if t < Tp and t < Th:
            return None                 # all rows update
        if t < Tp:
            return prem_rows            # only premise rows still running
        return 1.0 - prem_rows          # only hypothesis rows still running

    def recur(whh, write_hseq):
        """Serial recurrence over T steps; gx_sc holds x@W_ih + b for all t."""
        h = jnp.zeros((BP, H), jnp.float32)
        c = jnp.zeros((BP, H), jnp.float32)
        for t in range(T):                                   # static unroll
            gates = gx_sc[pl.ds(t * BP, BP), :] + jnp.dot(
                h, whh, preferred_element_type=jnp.float32)  # (BP, 4H)
            i = jax.nn.sigmoid(gates[:, 0:H])
            f = jax.nn.sigmoid(gates[:, H:2 * H])
            g = jnp.tanh(gates[:, 2 * H:3 * H])
            o = jax.nn.sigmoid(gates[:, 3 * H:4 * H])
            c_new = f * c + i * g
            h_new = o * jnp.tanh(c_new)
            m = upd_mask(t)
            if m is None:
                c, h = c_new, h_new
            else:
                c = m * c_new + (1.0 - m) * c
                h = m * h_new + (1.0 - m) * h
            if write_hseq:
                hseq_sc[pl.ds(t * BP, BP), :] = h
        return c

    # ---- layer 0: hoisted input projection, then recurrence ----
    gx_sc[...] = (jnp.dot(x_ref[...], wih0_ref[...],
                          preferred_element_type=jnp.float32) + b0_ref[...])
    recur(whh0_ref[...], write_hseq=True)

    # ---- layer 1: projection of the full layer-0 hidden sequence, recurrence ----
    gx_sc[...] = (jnp.dot(hseq_sc[...], wih1_ref[...],
                          preferred_element_type=jnp.float32) + b1_ref[...])
    c_last = recur(whh1_ref[...], write_hseq=False)          # (BP, H) final cells

    # ---- classifier head on concat([premise cell, hypothesis cell]) ----
    concat = jnp.concatenate([c_last[0:bs, :], c_last[bs:2 * bs, :]], axis=1)  # (bs, 2H)
    hid = jnp.maximum(
        jnp.dot(concat, wi_ref[...], preferred_element_type=jnp.float32)
        + bi_ref[...], 0.0)                                                    # (bs, H)
    out_ref[...] = (jnp.dot(hid, wo_ref[...], preferred_element_type=jnp.float32)
                    + bo_ref[...])                                             # (bs, 128)


_VMEM = pl.BlockSpec(memory_space=pltpu.MemorySpace.VMEM)


# ----------------------------------------------------------------------------
# Parameter init (PyTorch-layout) and one-time packing for the kernel
# ----------------------------------------------------------------------------
def init_params(key):
    ks = jax.random.split(key, 16)
    it = iter(ks)

    def unif(k, shape, bound):
        return jax.random.uniform(k, shape, jnp.float32, -bound, bound)

    emb = jax.random.normal(next(it), (VOCAB, EMBED), jnp.float32)
    emb = emb.at[0].set(0.0)                     # padding_idx = 0

    bound = 1.0 / np.sqrt(HIDDEN)
    lstm = []
    for layer in range(NUM_LAYERS):
        in_size = EMBED if layer == 0 else HIDDEN
        lstm.append((unif(next(it), (4 * HIDDEN, in_size), bound),   # w_ih
                     unif(next(it), (4 * HIDDEN, HIDDEN), bound),    # w_hh
                     unif(next(it), (4 * HIDDEN,), bound),           # b_ih
                     unif(next(it), (4 * HIDDEN,), bound)))          # b_hh

    bi = 1.0 / np.sqrt(2 * HIDDEN)
    int_w = unif(next(it), (HIDDEN, 2 * HIDDEN), bi)
    int_b = unif(next(it), (HIDDEN,), bi)
    bo = 1.0 / np.sqrt(HIDDEN)
    out_w = unif(next(it), (NUM_CLASSES, HIDDEN), bo)
    out_b = unif(next(it), (NUM_CLASSES,), bo)
    return {"embedding": emb, "lstm": lstm,
            "int_w": int_w, "int_b": int_b, "out_w": out_w, "out_b": out_b}


def pack_params(params):
    """One-time weight packing: transposes, bias folding, lane padding."""
    lstm_packed = []
    for (w_ih, w_hh, b_ih, b_hh) in params["lstm"]:
        lstm_packed.append((jnp.transpose(w_ih),                # (In, 4H)
                            jnp.transpose(w_hh),                # (H, 4H)
                            (b_ih + b_hh).reshape(1, -1)))      # (1, 4H)
    C = params["out_w"].shape[0]
    out_w = jnp.zeros((HIDDEN, LANE), jnp.float32).at[:, :C].set(
        jnp.transpose(params["out_w"]))
    out_b = jnp.zeros((1, LANE), jnp.float32).at[:, :C].set(
        params["out_b"].reshape(1, -1))
    return {"embedding": params["embedding"],
            "lstm": tuple(lstm_packed),
            "int_w": jnp.transpose(params["int_w"]),            # (2H, H)
            "int_b": params["int_b"].reshape(1, -1),            # (1, H)
            "out_w": out_w, "out_b": out_b}


# ----------------------------------------------------------------------------
# Forward pass
# ----------------------------------------------------------------------------
def _pad_stream(emb_bte, T, bs):
    """(B, Ts, E) -> zero-padded time-major (T, bs, E)."""
    B, Ts, E = emb_bte.shape
    x = jnp.zeros((T, bs, E), jnp.float32)
    return x.at[:Ts, :B, :].set(jnp.transpose(emb_bte, (1, 0, 2)))


@jax.jit
def uni_lstm_forward(packed, premises, hypotheses):
    """premises: (B, Tp) int32, hypotheses: (B, Th) int32. Returns (B, C)."""
    emb = packed["embedding"]
    B, Tp = premises.shape
    _, Th = hypotheses.shape
    T = max(Tp, Th)
    bs = max(8, ((B + 7) // 8) * 8)     # per-stream batch, padded to sublane grain
    BP = 2 * bs

    # TODO(synk): fix_padding works on Python lists of variable-length tensors;
    # here we take already-padded (B, T) id arrays (same forward semantics).
    p_emb = emb[premises]               # (B, Tp, E)  embedding gather = XLA glue
    h_emb = emb[hypotheses]             # (B, Th, E)

    x = jnp.concatenate([_pad_stream(p_emb, T, bs),
                         _pad_stream(h_emb, T, bs)], axis=1)    # (T, BP, E)
    x_flat = x.reshape(T * BP, EMBED)

    (wih0, whh0, b0), (wih1, whh1, b1) = packed["lstm"]

    kernel = functools.partial(_fused_unilstm_kernel, T=T, Tp=Tp, Th=Th, bs=bs)
    # TODO(synk): on v7x both streams could be split across the 2 TensorCores
    # with a parallel grid axis; here they are fused into one batch instead.
    out_pad = pl.pallas_call(
        kernel,
        out_shape=jax.ShapeDtypeStruct((bs, LANE), jnp.float32),
        in_specs=[_VMEM] * 11,
        out_specs=_VMEM,
        scratch_shapes=[pltpu.VMEM((T * BP, 4 * HIDDEN), jnp.float32),  # gate proj
                        pltpu.VMEM((T * BP, HIDDEN), jnp.float32)],     # layer-0 h seq
    )(x_flat, wih0, whh0, b0, wih1, whh1, b1,
      packed["int_w"], packed["int_b"], packed["out_w"], packed["out_b"])

    return out_pad[:B, :NUM_CLASSES]


# ----------------------------------------------------------------------------
# Pure-JAX reference (same math as PyTorch UniLSTM forward) for sanity check
# ----------------------------------------------------------------------------
def _ref_lstm_last_cell(x_bte, layers):
    B, T, _ = x_bte.shape
    inp = jnp.transpose(x_bte, (1, 0, 2))       # (T, B, In)
    c = None
    for (w_ih, w_hh, b_ih, b_hh) in layers:
        H = w_hh.shape[1]
        h = jnp.zeros((B, H), jnp.float32)
        c = jnp.zeros((B, H), jnp.float32)
        hs = []
        for t in range(T):
            gates = inp[t] @ w_ih.T + h @ w_hh.T + b_ih + b_hh
            i = jax.nn.sigmoid(gates[:, 0:H])
            f = jax.nn.sigmoid(gates[:, H:2 * H])
            g = jnp.tanh(gates[:, 2 * H:3 * H])
            o = jax.nn.sigmoid(gates[:, 3 * H:4 * H])
            c = f * c + i * g
            h = o * jnp.tanh(c)
            hs.append(h)
        inp = jnp.stack(hs, 0)
    return c


def reference_forward(params, premises, hypotheses):
    emb = params["embedding"]
    p_c = _ref_lstm_last_cell(emb[premises], params["lstm"])
    h_c = _ref_lstm_last_cell(emb[hypotheses], params["lstm"])
    concat = jnp.concatenate([p_c, h_c], axis=1)                 # (B, 2H)
    x = jnp.maximum(concat @ params["int_w"].T + params["int_b"], 0.0)
    return x @ params["out_w"].T + params["out_b"]


# ----------------------------------------------------------------------------
if __name__ == "__main__":
    key = jax.random.PRNGKey(0)
    kp, kh, kw = jax.random.split(key, 3)

    B, TP, TH = 2, 8, 6
    premises = jax.random.randint(kp, (B, TP), 0, VOCAB, dtype=jnp.int32)
    hypotheses = jax.random.randint(kh, (B, TH), 0, VOCAB, dtype=jnp.int32)

    params = init_params(kw)
    packed = pack_params(params)          # one-time weight packing

    logits = uni_lstm_forward(packed, premises, hypotheses)
    logits = jax.block_until_ready(logits)

    ref = reference_forward(params, premises, hypotheses)
    np.testing.assert_allclose(np.asarray(logits), np.asarray(ref),
                               rtol=1e-4, atol=1e-4)
    assert logits.shape == (B, NUM_CLASSES)
    print("KERNEL_OK")
</pallas_src>

<mosaic_0001>
module attributes {stable_mosaic.version = 11 : i64} {
  func.func @_fused_unilstm_kernel(%arg0: memref<128x32xf32, #tpu.memory_space<vmem>>, %arg1: memref<32x128xf32, #tpu.memory_space<vmem>>, %arg2: memref<32x128xf32, #tpu.memory_space<vmem>>, %arg3: memref<1x128xf32, #tpu.memory_space<vmem>>, %arg4: memref<32x128xf32, #tpu.memory_space<vmem>>, %arg5: memref<32x128xf32, #tpu.memory_space<vmem>>, %arg6: memref<1x128xf32, #tpu.memory_space<vmem>>, %arg7: memref<64x32xf32, #tpu.memory_space<vmem>>, %arg8: memref<1x32xf32, #tpu.memory_space<vmem>>, %arg9: memref<32x128xf32, #tpu.memory_space<vmem>>, %arg10: memref<1x128xf32, #tpu.memory_space<vmem>>, %arg11: memref<8x128xf32, #tpu.memory_space<vmem>>, %arg12: memref<128x128xf32, #tpu.memory_space<vmem>>, %arg13: memref<128x32xf32, #tpu.memory_space<vmem>>) attributes {dimension_semantics = [], scalar_prefetch = 0 : i64, scratch_operands = 2 : i64, tpu.core_type = #tpu.core_type<tc>} {
    %0 = tpu.iota {dimensions = array<i32: 0>} : vector<16x1xi32>
    %c8_i32 = arith.constant 8 : i32
    %1 = vector.broadcast %c8_i32 : i32 to vector<16x1xi32>
    %2 = arith.cmpi slt, %0, %1 : vector<16x1xi32>
    %3 = arith.extui %2 : vector<16x1xi1> to vector<16x1xi32>
    %4 = arith.sitofp %3 : vector<16x1xi32> to vector<16x1xf32>
    %c0 = arith.constant 0 : index
    %c0_0 = arith.constant 0 : index
    %5 = vector.load %arg0[%c0, %c0_0] : memref<128x32xf32, #tpu.memory_space<vmem>>, vector<128x32xf32>
    %c0_1 = arith.constant 0 : index
    %c0_2 = arith.constant 0 : index
    %6 = vector.load %arg1[%c0_1, %c0_2] : memref<32x128xf32, #tpu.memory_space<vmem>>, vector<32x128xf32>
    %cst = arith.constant dense<0.000000e+00> : vector<128x128xf32>
    %7 = tpu.matmul %5, %6, %cst {dimension_numbers = #tpu.dot_dimension_numbers<[1], [0], [0], [1], [0, 0, 1, 1], [], []>} : vector<128x32xf32>, vector<32x128xf32>, vector<128x128xf32> -> vector<128x128xf32>
    %c0_3 = arith.constant 0 : index
    %c0_4 = arith.constant 0 : index
    %8 = vector.load %arg3[%c0_3, %c0_4] : memref<1x128xf32, #tpu.memory_space<vmem>>, vector<1x128xf32>
    %9 = vector.broadcast %8 : vector<1x128xf32> to vector<128x128xf32>
    %10 = arith.addf %7, %9 : vector<128x128xf32>
    %c0_5 = arith.constant 0 : index
    %c0_6 = arith.constant 0 : index
    %11 = vector.load %arg12[%c0_5, %c0_6] : memref<128x128xf32, #tpu.memory_space<vmem>>, vector<128x128xf32>
    tpu.vector_store %arg12[%c0_5, %c0_6], %10 {strides = array<i32>} : memref<128x128xf32, #tpu.memory_space<vmem>>, vector<128x128xf32>,
    %c0_7 = arith.constant 0 : index
    %c0_8 = arith.constant 0 : index
    %12 = vector.load %arg2[%c0_7, %c0_8] : memref<32x128xf32, #tpu.memory_space<vmem>>, vector<32x128xf32>
    %cst_9 = arith.constant 0.000000e+00 : f32
    %13 = vector.broadcast %cst_9 : f32 to vector<16x32xf32>
    %cst_10 = arith.constant 0.000000e+00 : f32
    %14 = vector.broadcast %cst_10 : f32 to vector<16x32xf32>
    %c0_11 = arith.constant 0 : index
    %c0_12 = arith.constant 0 : index
    %15 = vector.load %arg12[%c0_11, %c0_12] : memref<128x128xf32, #tpu.memory_space<vmem>>, vector<16x128xf32>
    %cst_13 = arith.constant dense<0.000000e+00> : vector<16x128xf32>
    %16 = tpu.matmul %13, %12, %cst_13 {dimension_numbers = #tpu.dot_dimension_numbers<[1], [0], [0], [1], [0, 0, 1, 1], [], []>} : vector<16x32xf32>, vector<32x128xf32>, vector<16x128xf32> -> vector<16x128xf32>
    %17 = arith.addf %15, %16 : vector<16x128xf32>
    %18 = vector.extract_strided_slice %17 {offsets = [0, 0], sizes = [16, 32], strides = [1, 1]} : vector<16x128xf32> to vector<16x32xf32>
    %19 = arith.negf %18 : vector<16x32xf32>
    %20 = math.exp %19 : vector<16x32xf32>
    %cst_14 = arith.constant 1.000000e+00 : f32
    %21 = vector.broadcast %cst_14 : f32 to vector<16x32xf32>
    %22 = arith.addf %21, %20 : vector<16x32xf32>
    %23 = arith.divf %21, %22 : vector<16x32xf32>
    %24 = vector.extract_strided_slice %17 {offsets = [0, 32], sizes = [16, 32], strides = [1, 1]} : vector<16x128xf32> to vector<16x32xf32>
    %25 = arith.negf %24 : vector<16x32xf32>
    %26 = math.exp %25 : vector<16x32xf32>
    %cst_15 = arith.constant 1.000000e+00 : f32
    %27 = vector.broadcast %cst_15 : f32 to vector<16x32xf32>
    %28 = arith.addf %27, %26 : vector<16x32xf32>
    %29 = arith.divf %27, %28 : vector<16x32xf32>
    %30 = vector.extract_strided_slice %17 {offsets = [0, 64], sizes = [16, 32], strides = [1, 1]} : vector<16x128xf32> to vector<16x32xf32>
    %31 = math.tanh %30 : vector<16x32xf32>
    %32 = vector.extract_strided_slice %17 {offsets = [0, 96], sizes = [16, 32], strides = [1, 1]} : vector<16x128xf32> to vector<16x32xf32>
    %33 = arith.negf %32 : vector<16x32xf32>
    %34 = math.exp %33 : vector<16x32xf32>
    %cst_16 = arith.constant 1.000000e+00 : f32
    %35 = vector.broadcast %cst_16 : f32 to vector<16x32xf32>
    %36 = arith.addf %35, %34 : vector<16x32xf32>
    %37 = arith.divf %35, %36 : vector<16x32xf32>
    %38 = arith.mulf %29, %14 : vector<16x32xf32>
    %39 = arith.mulf %23, %31 : vector<16x32xf32>
    %40 = arith.addf %38, %39 : vector<16x32xf32>
    %41 = math.tanh %40 : vector<16x32xf32>
    %42 = arith.mulf %37, %41 : vector<16x32xf32>
    %c0_17 = arith.constant 0 : index
    %c0_18 = arith.constant 0 : index
    %43 = vector.load %arg13[%c0_17, %c0_18] : memref<128x32xf32, #tpu.memory_space<vmem>>, vector<16x32xf32>
    tpu.vector_store %arg13[%c0_17, %c0_18], %42 {strides = array<i32>} : memref<128x32xf32, #tpu.memory_space<vmem>>, vector<16x32xf32>,
    %c16 = arith.constant 16 : index
    %c0_19 = arith.constant 0 : index
    %44 = vector.load %arg12[%c16, %c0_19] : memref<128x128xf32, #tpu.memory_space<vmem>>, vector<16x128xf32>
    %cst_20 = arith.constant dense<0.000000e+00> : vector<16x128xf32>
    %45 = tpu.matmul %42, %12, %cst_20 {dimension_numbers = #tpu.dot_dimension_numbers<[1], [0], [0], [1], [0, 0, 1, 1], [], []>} : vector<16x32xf32>, vector<32x128xf32>, vector<16x128xf32> -> vector<16x128xf32>
    %46 = arith.addf %44, %45 : vector<16x128xf32>
    %47 = vector.extract_strided_slice %46 {offsets = [0, 0], sizes = [16, 32], strides = [1, 1]} : vector<16x128xf32> to vector<16x32xf32>
    %48 = arith.negf %47 : vector<16x32xf32>
    %49 = math.exp %48 : vector<16x32xf32>
    %cst_21 = arith.constant 1.000000e+00 : f32
    %50 = vector.broadcast %cst_21 : f32 to vector<16x32xf32>
    %51 = arith.addf %50, %49 : vector<16x32xf32>
    %52 = arith.divf %50, %51 : vector<16x32xf32>
    %53 = vector.extract_strided_slice %46 {offsets = [0, 32], sizes = [16, 32], strides = [1, 1]} : vector<16x128xf32> to vector<16x32xf32>
    %54 = arith.negf %53 : vector<16x32xf32>
    %55 = math.exp %54 : vector<16x32xf32>
    %cst_22 = arith.constant 1.000000e+00 : f32
    %56 = vector.broadcast %cst_22 : f32 to vector<16x32xf32>
    %57 = arith.addf %56, %55 : vector<16x32xf32>
    %58 = arith.divf %56, %57 : vector<16x32xf32>
    %59 = vector.extract_strided_slice %46 {offsets = [0, 64], sizes = [16, 32], strides = [1, 1]} : vector<16x128xf32> to vector<16x32xf32>
    %60 = math.tanh %59 : vector<16x32xf32>
    %61 = vector.extract_strided_slice %46 {offsets = [0, 96], sizes = [16, 32], strides = [1, 1]} : vector<16x128xf32> to vector<16x32xf32>
    %62 = arith.negf %61 : vector<16x32xf32>
    %63 = math.exp %62 : vector<16x32xf32>
    %cst_23 = arith.constant 1.000000e+00 : f32
    %64 = vector.broadcast %cst_23 : f32 to vector<16x32xf32>
    %65 = arith.addf %64, %63 : vector<16x32xf32>
    %66 = arith.divf %64, %65 : vector<16x32xf32>
    %67 = arith.mulf %58, %40 : vector<16x32xf32>
    %68 = arith.mulf %52, %60 : vector<16x32xf32>
    %69 = arith.addf %67, %68 : vector<16x32xf32>
    %70 = math.tanh %69 : vector<16x32xf32>
    %71 = arith.mulf %66, %70 : vector<16x32xf32>
    %c16_24 = arith.constant 16 : index
    %c0_25 = arith.constant 0 : index
    %72 = vector.load %arg13[%c16_24, %c0_25] : memref<128x32xf32, #tpu.memory_space<vmem>>, vector<16x32xf32>
    tpu.vector_store %arg13[%c16_24, %c0_25], %71 {strides = array<i32>} : memref<128x32xf32, #tpu.memory_space<vmem>>, vector<16x32xf32>,
    %c32 = arith.constant 32 : index
    %c0_26 = arith.constant 0 : index
    %73 = vector.load %arg12[%c32, %c0_26] : memref<128x128xf32, #tpu.memory_space<vmem>>, vector<16x128xf32>
    %cst_27 = arith.constant dense<0.000000e+00> : vector<16x128xf32>
    %74 = tpu.matmul %71, %12, %cst_27 {dimension_numbers = #tpu.dot_dimension_numbers<[1], [0], [0], [1], [0, 0, 1, 1], [], []>} : vector<16x32xf32>, vector<32x128xf32>, vector<16x128xf32> -> vector<16x128xf32>
    %75 = arith.addf %73, %74 : vector<16x128xf32>
    %76 = vector.extract_strided_slice %75 {offsets = [0, 0], sizes = [16, 32], strides = [1, 1]} : vector<16x128xf32> to vector<16x32xf32>
    %77 = arith.negf %76 : vector<16x32xf32>
    %78 = math.exp %77 : vector<16x32xf32>
    %cst_28 = arith.constant 1.000000e+00 : f32
    %79 = vector.broadcast %cst_28 : f32 to vector<16x32xf32>
    %80 = arith.addf %79, %78 : vector<16x32xf32>
    %81 = arith.divf %79, %80 : vector<16x32xf32>
    %82 = vector.extract_strided_slice %75 {offsets = [0, 32], sizes = [16, 32], strides = [1, 1]} : vector<16x128xf32> to vector<16x32xf32>
    %83 = arith.negf %82 : vector<16x32xf32>
    %84 = math.exp %83 : vector<16x32xf32>
    %cst_29 = arith.constant 1.000000e+00 : f32
    %85 = vector.broadcast %cst_29 : f32 to vector<16x32xf32>
    %86 = arith.addf %85, %84 : vector<16x32xf32>
    %87 = arith.divf %85, %86 : vector<16x32xf32>
    %88 = vector.extract_strided_slice %75 {offsets = [0, 64], sizes = [16, 32], strides = [1, 1]} : vector<16x128xf32> to vector<16x32xf32>
    %89 = math.tanh %88 : vector<16x32xf32>
    %90 = vector.extract_strided_slice %75 {offsets = [0, 96], sizes = [16, 32], strides = [1, 1]} : vector<16x128xf32> to vector<16x32xf32>
    %91 = arith.negf %90 : vector<16x32xf32>
    %92 = math.exp %91 : vector<16x32xf32>
    %cst_30 = arith.constant 1.000000e+00 : f32
    %93 = vector.broadcast %cst_30 : f32 to vector<16x32xf32>
    %94 = arith.addf %93, %92 : vector<16x32xf32>
    %95 = arith.divf %93, %94 : vector<16x32xf32>
    %96 = arith.mulf %87, %69 : vector<16x32xf32>
    %97 = arith.mulf %81, %89 : vector<16x32xf32>
    %98 = arith.addf %96, %97 : vector<16x32xf32>
    %99 = math.tanh %98 : vector<16x32xf32>
    %100 = arith.mulf %95, %99 : vector<16x32xf32>
    %c32_31 = arith.constant 32 : index
    %c0_32 = arith.constant 0 : index
    %101 = vector.load %arg13[%c32_31, %c0_32] : memref<128x32xf32, #tpu.memory_space<vmem>>, vector<16x32xf32>
    tpu.vector_store %arg13[%c32_31, %c0_32], %100 {strides = array<i32>} : memref<128x32xf32, #tpu.memory_space<vmem>>, vector<16x32xf32>,
    %c48 = arith.constant 48 : index
    %c0_33 = arith.constant 0 : index
    %102 = vector.load %arg12[%c48, %c0_33] : memref<128x128xf32, #tpu.memory_space<vmem>>, vector<16x128xf32>
    %cst_34 = arith.constant dense<0.000000e+00> : vector<16x128xf32>
    %103 = tpu.matmul %100, %12, %cst_34 {dimension_numbers = #tpu.dot_dimension_numbers<[1], [0], [0], [1], [0, 0, 1, 1], [], []>} : vector<16x32xf32>, vector<32x128xf32>, vector<16x128xf32> -> vector<16x128xf32>
    %104 = arith.addf %102, %103 : vector<16x128xf32>
    %105 = vector.extract_strided_slice %104 {offsets = [0, 0], sizes = [16, 32], strides = [1, 1]} : vector<16x128xf32> to vector<16x32xf32>
    %106 = arith.negf %105 : vector<16x32xf32>
    %107 = math.exp %106 : vector<16x32xf32>
    %cst_35 = arith.constant 1.000000e+00 : f32
    %108 = vector.broadcast %cst_35 : f32 to vector<16x32xf32>
    %109 = arith.addf %108, %107 : vector<16x32xf32>
    %110 = arith.divf %108, %109 : vector<16x32xf32>
    %111 = vector.extract_strided_slice %104 {offsets = [0, 32], sizes = [16, 32], strides = [1, 1]} : vector<16x128xf32> to vector<16x32xf32>
    %112 = arith.negf %111 : vector<16x32xf32>
    %113 = math.exp %112 : vector<16x32xf32>
    %cst_36 = arith.constant 1.000000e+00 : f32
    %114 = vector.broadcast %cst_36 : f32 to vector<16x32xf32>
    %115 = arith.addf %114, %113 : vector<16x32xf32>
    %116 = arith.divf %114, %115 : vector<16x32xf32>
    %117 = vector.extract_strided_slice %104 {offsets = [0, 64], sizes = [16, 32], strides = [1, 1]} : vector<16x128xf32> to vector<16x32xf32>
    %118 = math.tanh %117 : vector<16x32xf32>
    %119 = vector.extract_strided_slice %104 {offsets = [0, 96], sizes = [16, 32], strides = [1, 1]} : vector<16x128xf32> to vector<16x32xf32>
    %120 = arith.negf %119 : vector<16x32xf32>
    %121 = math.exp %120 : vector<16x32xf32>
    %cst_37 = arith.constant 1.000000e+00 : f32
    %122 = vector.broadcast %cst_37 : f32 to vector<16x32xf32>
    %123 = arith.addf %122, %121 : vector<16x32xf32>
    %124 = arith.divf %122, %123 : vector<16x32xf32>
    %125 = arith.mulf %116, %98 : vector<16x32xf32>
    %126 = arith.mulf %110, %118 : vector<16x32xf32>
    %127 = arith.addf %125, %126 : vector<16x32xf32>
    %128 = math.tanh %127 : vector<16x32xf32>
    %129 = arith.mulf %124, %128 : vector<16x32xf32>
    %c48_38 = arith.constant 48 : index
    %c0_39 = arith.constant 0 : index
    %130 = vector.load %arg13[%c48_38, %c0_39] : memref<128x32xf32, #tpu.memory_space<vmem>>, vector<16x32xf32>
    tpu.vector_store %arg13[%c48_38, %c0_39], %129 {strides = array<i32>} : memref<128x32xf32, #tpu.memory_space<vmem>>, vector<16x32xf32>,
    %c64 = arith.constant 64 : index
    %c0_40 = arith.constant 0 : index
    %131 = vector.load %arg12[%c64, %c0_40] : memref<128x128xf32, #tpu.memory_space<vmem>>, vector<16x128xf32>
    %cst_41 = arith.constant dense<0.000000e+00> : vector<16x128xf32>
    %132 = tpu.matmul %129, %12, %cst_41 {dimension_numbers = #tpu.dot_dimension_numbers<[1], [0], [0], [1], [0, 0, 1, 1], [], []>} : vector<16x32xf32>, vector<32x128xf32>, vector<16x128xf32> -> vector<16x128xf32>
    %133 = arith.addf %131, %132 : vector<16x128xf32>
    %134 = vector.extract_strided_slice %133 {offsets = [0, 0], sizes = [16, 32], strides = [1, 1]} : vector<16x128xf32> to vector<16x32xf32>
    %135 = arith.negf %134 : vector<16x32xf32>
    %136 = math.exp %135 : vector<16x32xf32>
    %cst_42 = arith.constant 1.000000e+00 : f32
    %137 = vector.broadcast %cst_42 : f32 to vector<16x32xf32>
    %138 = arith.addf %137, %136 : vector<16x32xf32>
    %139 = arith.divf %137, %138 : vector<16x32xf32>
    %140 = vector.extract_strided_slice %133 {offsets = [0, 32], sizes = [16, 32], strides = [1, 1]} : vector<16x128xf32> to vector<16x32xf32>
    %141 = arith.negf %140 : vector<16x32xf32>
    %142 = math.exp %141 : vector<16x32xf32>
    %cst_43 = arith.constant 1.000000e+00 : f32
    %143 = vector.broadcast %cst_43 : f32 to vector<16x32xf32>
    %144 = arith.addf %143, %142 : vector<16x32xf32>
    %145 = arith.divf %143, %144 : vector<16x32xf32>
    %146 = vector.extract_strided_slice %133 {offsets = [0, 64], sizes = [16, 32], strides = [1, 1]} : vector<16x128xf32> to vector<16x32xf32>
    %147 = math.tanh %146 : vector<16x32xf32>
    %148 = vector.extract_strided_slice %133 {offsets = [0, 96], sizes = [16, 32], strides = [1, 1]} : vector<16x128xf32> to vector<16x32xf32>
    %149 = arith.negf %148 : vector<16x32xf32>
    %150 = math.exp %149 : vector<16x32xf32>
    %cst_44 = arith.constant 1.000000e+00 : f32
    %151 = vector.broadcast %cst_44 : f32 to vector<16x32xf32>
    %152 = arith.addf %151, %150 : vector<16x32xf32>
    %153 = arith.divf %151, %152 : vector<16x32xf32>
    %154 = arith.mulf %145, %127 : vector<16x32xf32>
    %155 = arith.mulf %139, %147 : vector<16x32xf32>
    %156 = arith.addf %154, %155 : vector<16x32xf32>
    %157 = math.tanh %156 : vector<16x32xf32>
    %158 = arith.mulf %153, %157 : vector<16x32xf32>
    %c64_45 = arith.constant 64 : index
    %c0_46 = arith.constant 0 : index
    %159 = vector.load %arg13[%c64_45, %c0_46] : memref<128x32xf32, #tpu.memory_space<vmem>>, vector<16x32xf32>
    tpu.vector_store %arg13[%c64_45, %c0_46], %158 {strides = array<i32>} : memref<128x32xf32, #tpu.memory_space<vmem>>, vector<16x32xf32>,
    %c80 = arith.constant 80 : index
    %c0_47 = arith.constant 0 : index
    %160 = vector.load %arg12[%c80, %c0_47] : memref<128x128xf32, #tpu.memory_space<vmem>>, vector<16x128xf32>
    %cst_48 = arith.constant dense<0.000000e+00> : vector<16x128xf32>
    %161 = tpu.matmul %158, %12, %cst_48 {dimension_numbers = #tpu.dot_dimension_numbers<[1], [0], [0], [1], [0, 0, 1, 1], [], []>} : vector<16x32xf32>, vector<32x128xf32>, vector<16x128xf32> -> vector<16x128xf32>
    %162 = arith.addf %160, %161 : vector<16x128xf32>
    %163 = vector.extract_strided_slice %162 {offsets = [0, 0], sizes = [16, 32], strides = [1, 1]} : vector<16x128xf32> to vector<16x32xf32>
    %164 = arith.negf %163 : vector<16x32xf32>
    %165 = math.exp %164 : vector<16x32xf32>
    %cst_49 = arith.constant 1.000000e+00 : f32
    %166 = vector.broadcast %cst_49 : f32 to vector<16x32xf32>
    %167 = arith.addf %166, %165 : vector<16x32xf32>
    %168 = arith.divf %166, %167 : vector<16x32xf32>
    %169 = vector.extract_strided_slice %162 {offsets = [0, 32], sizes = [16, 32], strides = [1, 1]} : vector<16x128xf32> to vector<16x32xf32>
    %170 = arith.negf %169 : vector<16x32xf32>
    %171 = math.exp %170 : vector<16x32xf32>
    %cst_50 = arith.constant 1.000000e+00 : f32
    %172 = vector.broadcast %cst_50 : f32 to vector<16x32xf32>
    %173 = arith.addf %172, %171 : vector<16x32xf32>
    %174 = arith.divf %172, %173 : vector<16x32xf32>
    %175 = vector.extract_strided_slice %162 {offsets = [0, 64], sizes = [16, 32], strides = [1, 1]} : vector<16x128xf32> to vector<16x32xf32>
    %176 = math.tanh %175 : vector<16x32xf32>
    %177 = vector.extract_strided_slice %162 {offsets = [0, 96], sizes = [16, 32], strides = [1, 1]} : vector<16x128xf32> to vector<16x32xf32>
    %178 = arith.negf %177 : vector<16x32xf32>
    %179 = math.exp %178 : vector<16x32xf32>
    %cst_51 = arith.constant 1.000000e+00 : f32
    %180 = vector.broadcast %cst_51 : f32 to vector<16x32xf32>
    %181 = arith.addf %180, %179 : vector<16x32xf32>
    %182 = arith.divf %180, %181 : vector<16x32xf32>
    %183 = arith.mulf %174, %156 : vector<16x32xf32>
    %184 = arith.mulf %168, %176 : vector<16x32xf32>
    %185 = arith.addf %183, %184 : vector<16x32xf32>
    %186 = math.tanh %185 : vector<16x32xf32>
    %187 = arith.mulf %182, %186 : vector<16x32xf32>
    %c80_52 = arith.constant 80 : index
    %c0_53 = arith.constant 0 : index
    %188 = vector.load %arg13[%c80_52, %c0_53] : memref<128x32xf32, #tpu.memory_space<vmem>>, vector<16x32xf32>
    tpu.vector_store %arg13[%c80_52, %c0_53], %187 {strides = array<i32>} : memref<128x32xf32, #tpu.memory_space<vmem>>, vector<16x32xf32>,
    %c96 = arith.constant 96 : index
    %c0_54 = arith.constant 0 : index
    %189 = vector.load %arg12[%c96, %c0_54] : memref<128x128xf32, #tpu.memory_space<vmem>>, vector<16x128xf32>
    %cst_55 = arith.constant dense<0.000000e+00> : vector<16x128xf32>
    %190 = tpu.matmul %187, %12, %cst_55 {dimension_numbers = #tpu.dot_dimension_numbers<[1], [0], [0], [1], [0, 0, 1, 1], [], []>} : vector<16x32xf32>, vector<32x128xf32>, vector<16x128xf32> -> vector<16x128xf32>
    %191 = arith.addf %189, %190 : vector<16x128xf32>
    %192 = vector.extract_strided_slice %191 {offsets = [0, 0], sizes = [16, 32], strides = [1, 1]} : vector<16x128xf32> to vector<16x32xf32>
    %193 = arith.negf %192 : vector<16x32xf32>
    %194 = math.exp %193 : vector<16x32xf32>
    %cst_56 = arith.constant 1.000000e+00 : f32
    %195 = vector.broadcast %cst_56 : f32 to vector<16x32xf32>
    %196 = arith.addf %195, %194 : vector<16x32xf32>
    %197 = arith.divf %195, %196 : vector<16x32xf32>
    %198 = vector.extract_strided_slice %191 {offsets = [0, 32], sizes = [16, 32], strides = [1, 1]} : vector<16x128xf32> to vector<16x32xf32>
    %199 = arith.negf %198 : vector<16x32xf32>
    %200 = math.exp %199 : vector<16x32xf32>
    %cst_57 = arith.constant 1.000000e+00 : f32
    %201 = vector.broadcast %cst_57 : f32 to vector<16x32xf32>
    %202 = arith.addf %201, %200 : vector<16x32xf32>
    %203 = arith.divf %201, %202 : vector<16x32xf32>
    %204 = vector.extract_strided_slice %191 {offsets = [0, 64], sizes = [16, 32], strides = [1, 1]} : vector<16x128xf32> to vector<16x32xf32>
    %205 = math.tanh %204 : vector<16x32xf32>
    %206 = vector.extract_strided_slice %191 {offsets = [0, 96], sizes = [16, 32], strides = [1, 1]} : vector<16x128xf32> to vector<16x32xf32>
    %207 = arith.negf %206 : vector<16x32xf32>
    %208 = math.exp %207 : vector<16x32xf32>
    %cst_58 = arith.constant 1.000000e+00 : f32
    %209 = vector.broadcast %cst_58 : f32 to vector<16x32xf32>
    %210 = arith.addf %209, %208 : vector<16x32xf32>
    %211 = arith.divf %209, %210 : vector<16x32xf32>
    %212 = arith.mulf %203, %185 : vector<16x32xf32>
    %213 = arith.mulf %197, %205 : vector<16x32xf32>
    %214 = arith.addf %212, %213 : vector<16x32xf32>
    %215 = math.tanh %214 : vector<16x32xf32>
    %216 = arith.mulf %211, %215 : vector<16x32xf32>
    %217 = vector.broadcast %4 : vector<16x1xf32> to vector<16x32xf32>
    %218 = arith.mulf %217, %214 : vector<16x32xf32>
    %cst_59 = arith.constant 1.000000e+00 : f32
    %219 = vector.broadcast %cst_59 : f32 to vector<16x1xf32>
    %220 = arith.subf %219, %4 : vector<16x1xf32>
    %221 = vector.broadcast %220 : vector<16x1xf32> to vector<16x32xf32>
    %222 = arith.mulf %221, %185 : vector<16x32xf32>
    %223 = arith.addf %218, %222 : vector<16x32xf32>
    %224 = vector.broadcast %4 : vector<16x1xf32> to vector<16x32xf32>
    %225 = arith.mulf %224, %216 : vector<16x32xf32>
    %cst_60 = arith.constant 1.000000e+00 : f32
    %226 = vector.broadcast %cst_60 : f32 to vector<16x1xf32>
    %227 = arith.subf %226, %4 : vector<16x1xf32>
    %228 = vector.broadcast %227 : vector<16x1xf32> to vector<16x32xf32>
    %229 = arith.mulf %228, %187 : vector<16x32xf32>
    %230 = arith.addf %225, %229 : vector<16x32xf32>
    %c96_61 = arith.constant 96 : index
    %c0_62 = arith.constant 0 : index
    %231 = vector.load %arg13[%c96_61, %c0_62] : memref<128x32xf32, #tpu.memory_space<vmem>>, vector<16x32xf32>
    tpu.vector_store %arg13[%c96_61, %c0_62], %230 {strides = array<i32>} : memref<128x32xf32, #tpu.memory_space<vmem>>, vector<16x32xf32>,
    %c112 = arith.constant 112 : index
    %c0_63 = arith.constant 0 : index
    %232 = vector.load %arg12[%c112, %c0_63] : memref<128x128xf32, #tpu.memory_space<vmem>>, vector<16x128xf32>
    %cst_64 = arith.constant dense<0.000000e+00> : vector<16x128xf32>
    %233 = tpu.matmul %230, %12, %cst_64 {dimension_numbers = #tpu.dot_dimension_numbers<[1], [0], [0], [1], [0, 0, 1, 1], [], []>} : vector<16x32xf32>, vector<32x128xf32>, vector<16x128xf32> -> vector<16x128xf32>
    %234 = arith.addf %232, %233 : vector<16x128xf32>
    %235 = vector.extract_strided_slice %234 {offsets = [0, 0], sizes = [16, 32], strides = [1, 1]} : vector<16x128xf32> to vector<16x32xf32>
    %236 = arith.negf %235 : vector<16x32xf32>
    %237 = math.exp %236 : vector<16x32xf32>
    %cst_65 = arith.constant 1.000000e+00 : f32
    %238 = vector.broadcast %cst_65 : f32 to vector<16x32xf32>
    %239 = arith.addf %238, %237 : vector<16x32xf32>
    %240 = arith.divf %238, %239 : vector<16x32xf32>
    %241 = vector.extract_strided_slice %234 {offsets = [0, 32], sizes = [16, 32], strides = [1, 1]} : vector<16x128xf32> to vector<16x32xf32>
    %242 = arith.negf %241 : vector<16x32xf32>
    %243 = math.exp %242 : vector<16x32xf32>
    %cst_66 = arith.constant 1.000000e+00 : f32
    %244 = vector.broadcast %cst_66 : f32 to vector<16x32xf32>
    %245 = arith.addf %244, %243 : vector<16x32xf32>
    %246 = arith.divf %244, %245 : vector<16x32xf32>
    %247 = vector.extract_strided_slice %234 {offsets = [0, 64], sizes = [16, 32], strides = [1, 1]} : vector<16x128xf32> to vector<16x32xf32>
    %248 = math.tanh %247 : vector<16x32xf32>
    %249 = vector.extract_strided_slice %234 {offsets = [0, 96], sizes = [16, 32], strides = [1, 1]} : vector<16x128xf32> to vector<16x32xf32>
    %250 = arith.negf %249 : vector<16x32xf32>
    %251 = math.exp %250 : vector<16x32xf32>
    %cst_67 = arith.constant 1.000000e+00 : f32
    %252 = vector.broadcast %cst_67 : f32 to vector<16x32xf32>
    %253 = arith.addf %252, %251 : vector<16x32xf32>
    %254 = arith.divf %252, %253 : vector<16x32xf32>
    %255 = arith.mulf %246, %223 : vector<16x32xf32>
    %256 = arith.mulf %240, %248 : vector<16x32xf32>
    %257 = arith.addf %255, %256 : vector<16x32xf32>
    %258 = math.tanh %257 : vector<16x32xf32>
    %259 = arith.mulf %254, %258 : vector<16x32xf32>
    %260 = vector.broadcast %4 : vector<16x1xf32> to vector<16x32xf32>
    %261 = arith.mulf %260, %259 : vector<16x32xf32>
    %cst_68 = arith.constant 1.000000e+00 : f32
    %262 = vector.broadcast %cst_68 : f32 to vector<16x1xf32>
    %263 = arith.subf %262, %4 : vector<16x1xf32>
    %264 = vector.broadcast %263 : vector<16x1xf32> to vector<16x32xf32>
    %265 = arith.mulf %264, %230 : vector<16x32xf32>
    %266 = arith.addf %261, %265 : vector<16x32xf32>
    %c112_69 = arith.constant 112 : index
    %c0_70 = arith.constant 0 : index
    %267 = vector.load %arg13[%c112_69, %c0_70] : memref<128x32xf32, #tpu.memory_space<vmem>>, vector<16x32xf32>
    tpu.vector_store %arg13[%c112_69, %c0_70], %266 {strides = array<i32>} : memref<128x32xf32, #tpu.memory_space<vmem>>, vector<16x32xf32>,
    %c0_71 = arith.constant 0 : index
    %c0_72 = arith.constant 0 : index
    %268 = vector.load %arg13[%c0_71, %c0_72] : memref<128x32xf32, #tpu.memory_space<vmem>>, vector<128x32xf32>
    %c0_73 = arith.constant 0 : index
    %c0_74 = arith.constant 0 : index
    %269 = vector.load %arg4[%c0_73, %c0_74] : memref<32x128xf32, #tpu.memory_space<vmem>>, vector<32x128xf32>
    %cst_75 = arith.constant dense<0.000000e+00> : vector<128x128xf32>
    %270 = tpu.matmul %268, %269, %cst_75 {dimension_numbers = #tpu.dot_dimension_numbers<[1], [0], [0], [1], [0, 0, 1, 1], [], []>} : vector<128x32xf32>, vector<32x128xf32>, vector<128x128xf32> -> vector<128x128xf32>
    %c0_76 = arith.constant 0 : index
    %c0_77 = arith.constant 0 : index
    %271 = vector.load %arg6[%c0_76, %c0_77] : memref<1x128xf32, #tpu.memory_space<vmem>>, vector<1x128xf32>
    %272 = vector.broadcast %271 : vector<1x128xf32> to vector<128x128xf32>
    %273 = arith.addf %270, %272 : vector<128x128xf32>
    %c0_78 = arith.constant 0 : index
    %c0_79 = arith.constant 0 : index
    %274 = vector.load %arg12[%c0_78, %c0_79] : memref<128x128xf32, #tpu.memory_space<vmem>>, vector<128x128xf32>
    tpu.vector_store %arg12[%c0_78, %c0_79], %273 {strides = array<i32>} : memref<128x128xf32, #tpu.memory_space<vmem>>, vector<128x128xf32>,
    %c0_80 = arith.constant 0 : index
    %c0_81 = arith.constant 0 : index
    %275 = vector.load %arg5[%c0_80, %c0_81] : memref<32x128xf32, #tpu.memory_space<vmem>>, vector<32x128xf32>
    %cst_82 = arith.constant 0.000000e+00 : f32
    %276 = vector.broadcast %cst_82 : f32 to vector<16x32xf32>
    %cst_83 = arith.constant 0.000000e+00 : f32
    %277 = vector.broadcast %cst_83 : f32 to vector<16x32xf32>
    %c0_84 = arith.constant 0 : index
    %c0_85 = arith.constant 0 : index
    %278 = vector.load %arg12[%c0_84, %c0_85] : memref<128x128xf32, #tpu.memory_space<vmem>>, vector<16x128xf32>
    %cst_86 = arith.constant dense<0.000000e+00> : vector<16x128xf32>
    %279 = tpu.matmul %276, %275, %cst_86 {dimension_numbers = #tpu.dot_dimension_numbers<[1], [0], [0], [1], [0, 0, 1, 1], [], []>} : vector<16x32xf32>, vector<32x128xf32>, vector<16x128xf32> -> vector<16x128xf32>
    %280 = arith.addf %278, %279 : vector<16x128xf32>
    %281 = vector.extract_strided_slice %280 {offsets = [0, 0], sizes = [16, 32], strides = [1, 1]} : vector<16x128xf32> to vector<16x32xf32>
    %282 = arith.negf %281 : vector<16x32xf32>
    %283 = math.exp %282 : vector<16x32xf32>
    %cst_87 = arith.constant 1.000000e+00 : f32
    %284 = vector.broadcast %cst_87 : f32 to vector<16x32xf32>
    %285 = arith.addf %284, %283 : vector<16x32xf32>
    %286 = arith.divf %284, %285 : vector<16x32xf32>
    %287 = vector.extract_strided_slice %280 {offsets = [0, 32], sizes = [16, 32], strides = [1, 1]} : vector<16x128xf32> to vector<16x32xf32>
    %288 = arith.negf %287 : vector<16x32xf32>
    %289 = math.exp %288 : vector<16x32xf32>
    %cst_88 = arith.constant 1.000000e+00 : f32
    %290 = vector.broadcast %cst_88 : f32 to vector<16x32xf32>
    %291 = arith.addf %290, %289 : vector<16x32xf32>
    %292 = arith.divf %290, %291 : vector<16x32xf32>
    %293 = vector.extract_strided_slice %280 {offsets = [0, 64], sizes = [16, 32], strides = [1, 1]} : vector<16x128xf32> to vector<16x32xf32>
    %294 = math.tanh %293 : vector<16x32xf32>
    %295 = vector.extract_strided_slice %280 {offsets = [0, 96], sizes = [16, 32], strides = [1, 1]} : vector<16x128xf32> to vector<16x32xf32>
    %296 = arith.negf %295 : vector<16x32xf32>
    %297 = math.exp %296 : vector<16x32xf32>
    %cst_89 = arith.constant 1.000000e+00 : f32
    %298 = vector.broadcast %cst_89 : f32 to vector<16x32xf32>
    %299 = arith.addf %298, %297 : vector<16x32xf32>
    %300 = arith.divf %298, %299 : vector<16x32xf32>
    %301 = arith.mulf %292, %277 : vector<16x32xf32>
    %302 = arith.mulf %286, %294 : vector<16x32xf32>
    %303 = arith.addf %301, %302 : vector<16x32xf32>
    %304 = math.tanh %303 : vector<16x32xf32>
    %305 = arith.mulf %300, %304 : vector<16x32xf32>
    %c16_90 = arith.constant 16 : index
    %c0_91 = arith.constant 0 : index
    %306 = vector.load %arg12[%c16_90, %c0_91] : memref<128x128xf32, #tpu.memory_space<vmem>>, vector<16x128xf32>
    %cst_92 = arith.constant dense<0.000000e+00> : vector<16x128xf32>
    %307 = tpu.matmul %305, %275, %cst_92 {dimension_numbers = #tpu.dot_dimension_numbers<[1], [0], [0], [1], [0, 0, 1, 1], [], []>} : vector<16x32xf32>, vector<32x128xf32>, vector<16x128xf32> -> vector<16x128xf32>
    %308 = arith.addf %306, %307 : vector<16x128xf32>
    %309 = vector.extract_strided_slice %308 {offsets = [0, 0], sizes = [16, 32], strides = [1, 1]} : vector<16x128xf32> to vector<16x32xf32>
    %310 = arith.negf %309 : vector<16x32xf32>
    %311 = math.exp %310 : vector<16x32xf32>
    %cst_93 = arith.constant 1.000000e+00 : f32
    %312 = vector.broadcast %cst_93 : f32 to vector<16x32xf32>
    %313 = arith.addf %312, %311 : vector<16x32xf32>
    %314 = arith.divf %312, %313 : vector<16x32xf32>
    %315 = vector.extract_strided_slice %308 {offsets = [0, 32], sizes = [16, 32], strides = [1, 1]} : vector<16x128xf32> to vector<16x32xf32>
    %316 = arith.negf %315 : vector<16x32xf32>
    %317 = math.exp %316 : vector<16x32xf32>
    %cst_94 = arith.constant 1.000000e+00 : f32
    %318 = vector.broadcast %cst_94 : f32 to vector<16x32xf32>
    %319 = arith.addf %318, %317 : vector<16x32xf32>
    %320 = arith.divf %318, %319 : vector<16x32xf32>
    %321 = vector.extract_strided_slice %308 {offsets = [0, 64], sizes = [16, 32], strides = [1, 1]} : vector<16x128xf32> to vector<16x32xf32>
    %322 = math.tanh %321 : vector<16x32xf32>
    %323 = vector.extract_strided_slice %308 {offsets = [0, 96], sizes = [16, 32], strides = [1, 1]} : vector<16x128xf32> to vector<16x32xf32>
    %324 = arith.negf %323 : vector<16x32xf32>
    %325 = math.exp %324 : vector<16x32xf32>
    %cst_95 = arith.constant 1.000000e+00 : f32
    %326 = vector.broadcast %cst_95 : f32 to vector<16x32xf32>
    %327 = arith.addf %326, %325 : vector<16x32xf32>
    %328 = arith.divf %326, %327 : vector<16x32xf32>
    %329 = arith.mulf %320, %303 : vector<16x32xf32>
    %330 = arith.mulf %314, %322 : vector<16x32xf32>
    %331 = arith.addf %329, %330 : vector<16x32xf32>
    %332 = math.tanh %331 : vector<16x32xf32>
    %333 = arith.mulf %328, %332 : vector<16x32xf32>
    %c32_96 = arith.constant 32 : index
    %c0_97 = arith.constant 0 : index
    %334 = vector.load %arg12[%c32_96, %c0_97] : memref<128x128xf32, #tpu.memory_space<vmem>>, vector<16x128xf32>
    %cst_98 = arith.constant dense<0.000000e+00> : vector<16x128xf32>
    %335 = tpu.matmul %333, %275, %cst_98 {dimension_numbers = #tpu.dot_dimension_numbers<[1], [0], [0], [1], [0, 0, 1, 1], [], []>} : vector<16x32xf32>, vector<32x128xf32>, vector<16x128xf32> -> vector<16x128xf32>
    %336 = arith.addf %334, %335 : vector<16x128xf32>
    %337 = vector.extract_strided_slice %336 {offsets = [0, 0], sizes = [16, 32], strides = [1, 1]} : vector<16x128xf32> to vector<16x32xf32>
    %338 = arith.negf %337 : vector<16x32xf32>
    %339 = math.exp %338 : vector<16x32xf32>
    %cst_99 = arith.constant 1.000000e+00 : f32
    %340 = vector.broadcast %cst_99 : f32 to vector<16x32xf32>
    %341 = arith.addf %340, %339 : vector<16x32xf32>
    %342 = arith.divf %340, %341 : vector<16x32xf32>
    %343 = vector.extract_strided_slice %336 {offsets = [0, 32], sizes = [16, 32], strides = [1, 1]} : vector<16x128xf32> to vector<16x32xf32>
    %344 = arith.negf %343 : vector<16x32xf32>
    %345 = math.exp %344 : vector<16x32xf32>
    %cst_100 = arith.constant 1.000000e+00 : f32
    %346 = vector.broadcast %cst_100 : f32 to vector<16x32xf32>
    %347 = arith.addf %346, %345 : vector<16x32xf32>
    %348 = arith.divf %346, %347 : vector<16x32xf32>
    %349 = vector.extract_strided_slice %336 {offsets = [0, 64], sizes = [16, 32], strides = [1, 1]} : vector<16x128xf32> to vector<16x32xf32>
    %350 = math.tanh %349 : vector<16x32xf32>
    %351 = vector.extract_strided_slice %336 {offsets = [0, 96], sizes = [16, 32], strides = [1, 1]} : vector<16x128xf32> to vector<16x32xf32>
    %352 = arith.negf %351 : vector<16x32xf32>
    %353 = math.exp %352 : vector<16x32xf32>
    %cst_101 = arith.constant 1.000000e+00 : f32
    %354 = vector.broadcast %cst_101 : f32 to vector<16x32xf32>
    %355 = arith.addf %354, %353 : vector<16x32xf32>
    %356 = arith.divf %354, %355 : vector<16x32xf32>
    %357 = arith.mulf %348, %331 : vector<16x32xf32>
    %358 = arith.mulf %342, %350 : vector<16x32xf32>
    %359 = arith.addf %357, %358 : vector<16x32xf32>
    %360 = math.tanh %359 : vector<16x32xf32>
    %361 = arith.mulf %356, %360 : vector<16x32xf32>
    %c48_102 = arith.constant 48 : index
    %c0_103 = arith.constant 0 : index
    %362 = vector.load %arg12[%c48_102, %c0_103] : memref<128x128xf32, #tpu.memory_space<vmem>>, vector<16x128xf32>
    %cst_104 = arith.constant dense<0.000000e+00> : vector<16x128xf32>
    %363 = tpu.matmul %361, %275, %cst_104 {dimension_numbers = #tpu.dot_dimension_numbers<[1], [0], [0], [1], [0, 0, 1, 1], [], []>} : vector<16x32xf32>, vector<32x128xf32>, vector<16x128xf32> -> vector<16x128xf32>
    %364 = arith.addf %362, %363 : vector<16x128xf32>
    %365 = vector.extract_strided_slice %364 {offsets = [0, 0], sizes = [16, 32], strides = [1, 1]} : vector<16x128xf32> to vector<16x32xf32>
    %366 = arith.negf %365 : vector<16x32xf32>
    %367 = math.exp %366 : vector<16x32xf32>
    %cst_105 = arith.constant 1.000000e+00 : f32
    %368 = vector.broadcast %cst_105 : f32 to vector<16x32xf32>
    %369 = arith.addf %368, %367 : vector<16x32xf32>
    %370 = arith.divf %368, %369 : vector<16x32xf32>
    %371 = vector.extract_strided_slice %364 {offsets = [0, 32], sizes = [16, 32], strides = [1, 1]} : vector<16x128xf32> to vector<16x32xf32>
    %372 = arith.negf %371 : vector<16x32xf32>
    %373 = math.exp %372 : vector<16x32xf32>
    %cst_106 = arith.constant 1.000000e+00 : f32
    %374 = vector.broadcast %cst_106 : f32 to vector<16x32xf32>
    %375 = arith.addf %374, %373 : vector<16x32xf32>
    %376 = arith.divf %374, %375 : vector<16x32xf32>
    %377 = vector.extract_strided_slice %364 {offsets = [0, 64], sizes = [16, 32], strides = [1, 1]} : vector<16x128xf32> to vector<16x32xf32>
    %378 = math.tanh %377 : vector<16x32xf32>
    %379 = vector.extract_strided_slice %364 {offsets = [0, 96], sizes = [16, 32], strides = [1, 1]} : vector<16x128xf32> to vector<16x32xf32>
    %380 = arith.negf %379 : vector<16x32xf32>
    %381 = math.exp %380 : vector<16x32xf32>
    %cst_107 = arith.constant 1.000000e+00 : f32
    %382 = vector.broadcast %cst_107 : f32 to vector<16x32xf32>
    %383 = arith.addf %382, %381 : vector<16x32xf32>
    %384 = arith.divf %382, %383 : vector<16x32xf32>
    %385 = arith.mulf %376, %359 : vector<16x32xf32>
    %386 = arith.mulf %370, %378 : vector<16x32xf32>
    %387 = arith.addf %385, %386 : vector<16x32xf32>
    %388 = math.tanh %387 : vector<16x32xf32>
    %389 = arith.mulf %384, %388 : vector<16x32xf32>
    %c64_108 = arith.constant 64 : index
    %c0_109 = arith.constant 0 : index
    %390 = vector.load %arg12[%c64_108, %c0_109] : memref<128x128xf32, #tpu.memory_space<vmem>>, vector<16x128xf32>
    %cst_110 = arith.constant dense<0.000000e+00> : vector<16x128xf32>
    %391 = tpu.matmul %389, %275, %cst_110 {dimension_numbers = #tpu.dot_dimension_numbers<[1], [0], [0], [1], [0, 0, 1, 1], [], []>} : vector<16x32xf32>, vector<32x128xf32>, vector<16x128xf32> -> vector<16x128xf32>
    %392 = arith.addf %390, %391 : vector<16x128xf32>
    %393 = vector.extract_strided_slice %392 {offsets = [0, 0], sizes = [16, 32], strides = [1, 1]} : vector<16x128xf32> to vector<16x32xf32>
    %394 = arith.negf %393 : vector<16x32xf32>
    %395 = math.exp %394 : vector<16x32xf32>
    %cst_111 = arith.constant 1.000000e+00 : f32
    %396 = vector.broadcast %cst_111 : f32 to vector<16x32xf32>
    %397 = arith.addf %396, %395 : vector<16x32xf32>
    %398 = arith.divf %396, %397 : vector<16x32xf32>
    %399 = vector.extract_strided_slice %392 {offsets = [0, 32], sizes = [16, 32], strides = [1, 1]} : vector<16x128xf32> to vector<16x32xf32>
    %400 = arith.negf %399 : vector<16x32xf32>
    %401 = math.exp %400 : vector<16x32xf32>
    %cst_112 = arith.constant 1.000000e+00 : f32
    %402 = vector.broadcast %cst_112 : f32 to vector<16x32xf32>
    %403 = arith.addf %402, %401 : vector<16x32xf32>
    %404 = arith.divf %402, %403 : vector<16x32xf32>
    %405 = vector.extract_strided_slice %392 {offsets = [0, 64], sizes = [16, 32], strides = [1, 1]} : vector<16x128xf32> to vector<16x32xf32>
    %406 = math.tanh %405 : vector<16x32xf32>
    %407 = vector.extract_strided_slice %392 {offsets = [0, 96], sizes = [16, 32], strides = [1, 1]} : vector<16x128xf32> to vector<16x32xf32>
    %408 = arith.negf %407 : vector<16x32xf32>
    %409 = math.exp %408 : vector<16x32xf32>
    %cst_113 = arith.constant 1.000000e+00 : f32
    %410 = vector.broadcast %cst_113 : f32 to vector<16x32xf32>
    %411 = arith.addf %410, %409 : vector<16x32xf32>
    %412 = arith.divf %410, %411 : vector<16x32xf32>
    %413 = arith.mulf %404, %387 : vector<16x32xf32>
    %414 = arith.mulf %398, %406 : vector<16x32xf32>
    %415 = arith.addf %413, %414 : vector<16x32xf32>
    %416 = math.tanh %415 : vector<16x32xf32>
    %417 = arith.mulf %412, %416 : vector<16x32xf32>
    %c80_114 = arith.constant 80 : index
    %c0_115 = arith.constant 0 : index
    %418 = vector.load %arg12[%c80_114, %c0_115] : memref<128x128xf32, #tpu.memory_space<vmem>>, vector<16x128xf32>
    %cst_116 = arith.constant dense<0.000000e+00> : vector<16x128xf32>
    %419 = tpu.matmul %417, %275, %cst_116 {dimension_numbers = #tpu.dot_dimension_numbers<[1], [0], [0], [1], [0, 0, 1, 1], [], []>} : vector<16x32xf32>, vector<32x128xf32>, vector<16x128xf32> -> vector<16x128xf32>
    %420 = arith.addf %418, %419 : vector<16x128xf32>
    %421 = vector.extract_strided_slice %420 {offsets = [0, 0], sizes = [16, 32], strides = [1, 1]} : vector<16x128xf32> to vector<16x32xf32>
    %422 = arith.negf %421 : vector<16x32xf32>
    %423 = math.exp %422 : vector<16x32xf32>
    %cst_117 = arith.constant 1.000000e+00 : f32
    %424 = vector.broadcast %cst_117 : f32 to vector<16x32xf32>
    %425 = arith.addf %424, %423 : vector<16x32xf32>
    %426 = arith.divf %424, %425 : vector<16x32xf32>
    %427 = vector.extract_strided_slice %420 {offsets = [0, 32], sizes = [16, 32], strides = [1, 1]} : vector<16x128xf32> to vector<16x32xf32>
    %428 = arith.negf %427 : vector<16x32xf32>
    %429 = math.exp %428 : vector<16x32xf32>
    %cst_118 = arith.constant 1.000000e+00 : f32
    %430 = vector.broadcast %cst_118 : f32 to vector<16x32xf32>
    %431 = arith.addf %430, %429 : vector<16x32xf32>
    %432 = arith.divf %430, %431 : vector<16x32xf32>
    %433 = vector.extract_strided_slice %420 {offsets = [0, 64], sizes = [16, 32], strides = [1, 1]} : vector<16x128xf32> to vector<16x32xf32>
    %434 = math.tanh %433 : vector<16x32xf32>
    %435 = vector.extract_strided_slice %420 {offsets = [0, 96], sizes = [16, 32], strides = [1, 1]} : vector<16x128xf32> to vector<16x32xf32>
    %436 = arith.negf %435 : vector<16x32xf32>
    %437 = math.exp %436 : vector<16x32xf32>
    %cst_119 = arith.constant 1.000000e+00 : f32
    %438 = vector.broadcast %cst_119 : f32 to vector<16x32xf32>
    %439 = arith.addf %438, %437 : vector<16x32xf32>
    %440 = arith.divf %438, %439 : vector<16x32xf32>
    %441 = arith.mulf %432, %415 : vector<16x32xf32>
    %442 = arith.mulf %426, %434 : vector<16x32xf32>
    %443 = arith.addf %441, %442 : vector<16x32xf32>
    %444 = math.tanh %443 : vector<16x32xf32>
    %445 = arith.mulf %440, %444 : vector<16x32xf32>
    %c96_120 = arith.constant 96 : index
    %c0_121 = arith.constant 0 : index
    %446 = vector.load %arg12[%c96_120, %c0_121] : memref<128x128xf32, #tpu.memory_space<vmem>>, vector<16x128xf32>
    %cst_122 = arith.constant dense<0.000000e+00> : vector<16x128xf32>
    %447 = tpu.matmul %445, %275, %cst_122 {dimension_numbers = #tpu.dot_dimension_numbers<[1], [0], [0], [1], [0, 0, 1, 1], [], []>} : vector<16x32xf32>, vector<32x128xf32>, vector<16x128xf32> -> vector<16x128xf32>
    %448 = arith.addf %446, %447 : vector<16x128xf32>
    %449 = vector.extract_strided_slice %448 {offsets = [0, 0], sizes = [16, 32], strides = [1, 1]} : vector<16x128xf32> to vector<16x32xf32>
    %450 = arith.negf %449 : vector<16x32xf32>
    %451 = math.exp %450 : vector<16x32xf32>
    %cst_123 = arith.constant 1.000000e+00 : f32
    %452 = vector.broadcast %cst_123 : f32 to vector<16x32xf32>
    %453 = arith.addf %452, %451 : vector<16x32xf32>
    %454 = arith.divf %452, %453 : vector<16x32xf32>
    %455 = vector.extract_strided_slice %448 {offsets = [0, 32], sizes = [16, 32], strides = [1, 1]} : vector<16x128xf32> to vector<16x32xf32>
    %456 = arith.negf %455 : vector<16x32xf32>
    %457 = math.exp %456 : vector<16x32xf32>
    %cst_124 = arith.constant 1.000000e+00 : f32
    %458 = vector.broadcast %cst_124 : f32 to vector<16x32xf32>
    %459 = arith.addf %458, %457 : vector<16x32xf32>
    %460 = arith.divf %458, %459 : vector<16x32xf32>
    %461 = vector.extract_strided_slice %448 {offsets = [0, 64], sizes = [16, 32], strides = [1, 1]} : vector<16x128xf32> to vector<16x32xf32>
    %462 = math.tanh %461 : vector<16x32xf32>
    %463 = vector.extract_strided_slice %448 {offsets = [0, 96], sizes = [16, 32], strides = [1, 1]} : vector<16x128xf32> to vector<16x32xf32>
    %464 = arith.negf %463 : vector<16x32xf32>
    %465 = math.exp %464 : vector<16x32xf32>
    %cst_125 = arith.constant 1.000000e+00 : f32
    %466 = vector.broadcast %cst_125 : f32 to vector<16x32xf32>
    %467 = arith.addf %466, %465 : vector<16x32xf32>
    %468 = arith.divf %466, %467 : vector<16x32xf32>
    %469 = arith.mulf %460, %443 : vector<16x32xf32>
    %470 = arith.mulf %454, %462 : vector<16x32xf32>
    %471 = arith.addf %469, %470 : vector<16x32xf32>
    %472 = math.tanh %471 : vector<16x32xf32>
    %473 = arith.mulf %468, %472 : vector<16x32xf32>
    %474 = vector.broadcast %4 : vector<16x1xf32> to vector<16x32xf32>
    %475 = arith.mulf %474, %471 : vector<16x32xf32>
    %cst_126 = arith.constant 1.000000e+00 : f32
    %476 = vector.broadcast %cst_126 : f32 to vector<16x1xf32>
    %477 = arith.subf %476, %4 : vector<16x1xf32>
    %478 = vector.broadcast %477 : vector<16x1xf32> to vector<16x32xf32>
    %479 = arith.mulf %478, %443 : vector<16x32xf32>
    %480 = arith.addf %475, %479 : vector<16x32xf32>
    %481 = vector.broadcast %4 : vector<16x1xf32> to vector<16x32xf32>
    %482 = arith.mulf %481, %473 : vector<16x32xf32>
    %cst_127 = arith.constant 1.000000e+00 : f32
    %483 = vector.broadcast %cst_127 : f32 to vector<16x1xf32>
    %484 = arith.subf %483, %4 : vector<16x1xf32>
    %485 = vector.broadcast %484 : vector<16x1xf32> to vector<16x32xf32>
    %486 = arith.mulf %485, %445 : vector<16x32xf32>
    %487 = arith.addf %482, %486 : vector<16x32xf32>
    %c112_128 = arith.constant 112 : index
    %c0_129 = arith.constant 0 : index
    %488 = vector.load %arg12[%c112_128, %c0_129] : memref<128x128xf32, #tpu.memory_space<vmem>>, vector<16x128xf32>
    %cst_130 = arith.constant dense<0.000000e+00> : vector<16x128xf32>
    %489 = tpu.matmul %487, %275, %cst_130 {dimension_numbers = #tpu.dot_dimension_numbers<[1], [0], [0], [1], [0, 0, 1, 1], [], []>} : vector<16x32xf32>, vector<32x128xf32>, vector<16x128xf32> -> vector<16x128xf32>
    %490 = arith.addf %488, %489 : vector<16x128xf32>
    %491 = vector.extract_strided_slice %490 {offsets = [0, 0], sizes = [16, 32], strides = [1, 1]} : vector<16x128xf32> to vector<16x32xf32>
    %492 = arith.negf %491 : vector<16x32xf32>
    %493 = math.exp %492 : vector<16x32xf32>
    %cst_131 = arith.constant 1.000000e+00 : f32
    %494 = vector.broadcast %cst_131 : f32 to vector<16x32xf32>
    %495 = arith.addf %494, %493 : vector<16x32xf32>
    %496 = arith.divf %494, %495 : vector<16x32xf32>
    %497 = vector.extract_strided_slice %490 {offsets = [0, 32], sizes = [16, 32], strides = [1, 1]} : vector<16x128xf32> to vector<16x32xf32>
    %498 = arith.negf %497 : vector<16x32xf32>
    %499 = math.exp %498 : vector<16x32xf32>
    %cst_132 = arith.constant 1.000000e+00 : f32
    %500 = vector.broadcast %cst_132 : f32 to vector<16x32xf32>
    %501 = arith.addf %500, %499 : vector<16x32xf32>
    %502 = arith.divf %500, %501 : vector<16x32xf32>
    %503 = vector.extract_strided_slice %490 {offsets = [0, 64], sizes = [16, 32], strides = [1, 1]} : vector<16x128xf32> to vector<16x32xf32>
    %504 = math.tanh %503 : vector<16x32xf32>
    %505 = arith.mulf %502, %480 : vector<16x32xf32>
    %506 = arith.mulf %496, %504 : vector<16x32xf32>
    %507 = arith.addf %505, %506 : vector<16x32xf32>
    %508 = vector.broadcast %4 : vector<16x1xf32> to vector<16x32xf32>
    %509 = arith.mulf %508, %507 : vector<16x32xf32>
    %cst_133 = arith.constant 1.000000e+00 : f32
    %510 = vector.broadcast %cst_133 : f32 to vector<16x1xf32>
    %511 = arith.subf %510, %4 : vector<16x1xf32>
    %512 = vector.broadcast %511 : vector<16x1xf32> to vector<16x32xf32>
    %513 = arith.mulf %512, %480 : vector<16x32xf32>
    %514 = arith.addf %509, %513 : vector<16x32xf32>
    %515 = vector.extract_strided_slice %514 {offsets = [0, 0], sizes = [8, 32], strides = [1, 1]} : vector<16x32xf32> to vector<8x32xf32>
    %516 = vector.extract_strided_slice %514 {offsets = [8, 0], sizes = [8, 32], strides = [1, 1]} : vector<16x32xf32> to vector<8x32xf32>
    %517 = tpu.concatenate %515, %516 in 1 : vector<8x32xf32>, vector<8x32xf32> -> vector<8x64xf32>
    %c0_134 = arith.constant 0 : index
    %c0_135 = arith.constant 0 : index
    %518 = vector.load %arg7[%c0_134, %c0_135] : memref<64x32xf32, #tpu.memory_space<vmem>>, vector<64x32xf32>
    %cst_136 = arith.constant dense<0.000000e+00> : vector<8x32xf32>
    %519 = tpu.matmul %517, %518, %cst_136 {dimension_numbers = #tpu.dot_dimension_numbers<[1], [0], [0], [1], [0, 0, 1, 1], [], []>} : vector<8x64xf32>, vector<64x32xf32>, vector<8x32xf32> -> vector<8x32xf32>
    %c0_137 = arith.constant 0 : index
    %c0_138 = arith.constant 0 : index
    %520 = vector.load %arg8[%c0_137, %c0_138] : memref<1x32xf32, #tpu.memory_space<vmem>>, vector<1x32xf32>
    %521 = vector.broadcast %520 : vector<1x32xf32> to vector<8x32xf32>
    %522 = arith.addf %519, %521 : vector<8x32xf32>
    %cst_139 = arith.constant 0.000000e+00 : f32
    %523 = vector.broadcast %cst_139 : f32 to vector<8x32xf32>
    %524 = arith.maximumf %522, %523 : vector<8x32xf32>
    %c0_140 = arith.constant 0 : index
    %c0_141 = arith.constant 0 : index
    %525 = vector.load %arg9[%c0_140, %c0_141] : memref<32x128xf32, #tpu.memory_space<vmem>>, vector<32x128xf32>
    %cst_142 = arith.constant dense<0.000000e+00> : vector<8x128xf32>
    %526 = tpu.matmul %524, %525, %cst_142 {dimension_numbers = #tpu.dot_dimension_numbers<[1], [0], [0], [1], [0, 0, 1, 1], [], []>} : vector<8x32xf32>, vector<32x128xf32>, vector<8x128xf32> -> vector<8x128xf32>
    %c0_143 = arith.constant 0 : index
    %c0_144 = arith.constant 0 : index
    %527 = vector.load %arg10[%c0_143, %c0_144] : memref<1x128xf32, #tpu.memory_space<vmem>>, vector<1x128xf32>
    %528 = vector.broadcast %527 : vector<1x128xf32> to vector<8x128xf32>
    %529 = arith.addf %526, %528 : vector<8x128xf32>
    %c0_145 = arith.constant 0 : index
    %c0_146 = arith.constant 0 : index
    %530 = vector.load %arg11[%c0_145, %c0_146] : memref<8x128xf32, #tpu.memory_space<vmem>>, vector<8x128xf32>
    tpu.vector_store %arg11[%c0_145, %c0_146], %529 {strides = array<i32>} : memref<8x128xf32, #tpu.memory_space<vmem>>, vector<8x128xf32>,
    return
  }
}

</mosaic_0001>

<bundles_post_ra>
// kernel: uni_lstm_forward.1
= control target key start
LH: loop header
LB: loop body
LE: loop exit
PB: predicated region body
PF: predicated region fallthrough
CT: control target
= control target key end

     0   :  { %vm74_vm0 = vcmask 261120   ;;  %v3953_v28 = vmov 0.0   ;;  %vm3957_vm1 = vmmov 0   ;;  %vm2787_vm2 = vcmask 523264   ;;  %s4530_s1 = inlined_call_operand.vmem [shape: f32[32,128], index: 1, kind: input, shape index: {}]   ;;  %s4531_s0 = inlined_call_operand.vmem [shape: f32[128,32], index: 0, kind: input, shape index: {}]   ;;  %s4532_s2 = inlined_call_operand.vmem [shape: f32[32,128], index: 2, kind: input, shape index: {}]   ;;  %s4533_s3 = inlined_call_operand.vmem [shape: f32[1,128], index: 3, kind: input, shape index: {}]   ;;  %s4534_s4 = inlined_call_operand.vmem [shape: f32[32,128], index: 4, kind: input, shape index: {}]   ;;  %s4535_s5 = inlined_call_operand.vmem [shape: f32[32,128], index: 5, kind: input, shape index: {}]   ;;  %s4536_s6 = inlined_call_operand.vmem [shape: f32[1,128], index: 6, kind: input, shape index: {}]   ;;  %s4537_s7 = inlined_call_operand.vmem [shape: f32[64,32], index: 7, kind: input, shape index: {}]   ;;  %s4538_s9 = inlined_call_operand.vmem [shape: f32[32,128], index: 9, kind: input, shape index: {}]   ;;  %s4539_s8 = inlined_call_operand.vmem [shape: f32[1,32], index: 8, kind: input, shape index: {}]   ;;  %s4540_s10 = inlined_call_operand.vmem [shape: f32[1,128], index: 10, kind: input, shape index: {}]   ;;  %s4541_s11 = inlined_call_operand.vmem [shape: f32[8,128], index: 11, kind: output, shape index: {}]  }
   0x1   :  { %v63_v0 = vld [vmem:[%s4530_s1] sm:$0xff]  ;;  %v64_v1 = vld [vmem:[%s4530_s1 + $0x8] sm:$0xff]  ;;  %v65_v2 = vld [vmem:[%s4530_s1 + $0x10] sm:$0xff] }
   0x2   :  { %v3469_v3 = vpack.c.bf16 %v64_v1, %v63_v0  ;;  %v66_v4 = vld [vmem:[%s4530_s1 + $0x18] sm:$0xff]  ;;  %v47_v5 = vld [vmem:[%s4531_s0] sm:$0xff]  ;;  %v285_v8 = vld [vmem:[%s4532_s2 + $0x8] sm:$0xff] }
   0x3   :  { %v3473_v6 = vpack.c.bf16 %v66_v4, %v65_v2  ;;  %3207 = vmatprep.mubr.msk.f32.mxu0 %vm74_vm0, %v47_v5  ;;  %v284_v7 = vld [vmem:[%s4532_s2] sm:$0xff]  ;;  %v286_v10 = vld [vmem:[%s4532_s2 + $0x10] sm:$0xff]  ;;  %v287_v11 = vld [vmem:[%s4532_s2 + $0x18] sm:$0xff] }
   0x4   :  { %3470 = vmatprep.subr.bf16.mxu0 %v3469_v3  ;;  %v4041_v9 = vpack.c.bf16 %v285_v8, %v284_v7  ;;  %v48_v12 = vld [vmem:[%s4531_s0 + $0x8] sm:$0xff]  ;;  %v49_v13 = vld [vmem:[%s4531_s0 + $0x10] sm:$0xff]  ;;  %v4056_v14 = vpack.c.bf16 %v287_v11, %v286_v10  ;;  %v50_v15 = vld [vmem:[%s4531_s0 + $0x18] sm:$0xff] }
   0x5   :  { %3472 = vmatpush3.bf16.msra.mxu0 %v3469_v3  ;;  %v51_v16 = vld [vmem:[%s4531_s0 + $0x20] sm:$0xff]  ;;  %v52_v17 = vld [vmem:[%s4531_s0 + $0x28] sm:$0xff]  ;;  %v53_v18 = vld [vmem:[%s4531_s0 + $0x30] sm:$0xff] }
   0x6   :  { %3474 = vmatprep.subr.bf16.mxu0 %v3473_v6  ;;  %v54_v19 = vld [vmem:[%s4531_s0 + $0x38] sm:$0xff]  ;;  %v55_v20 = vld [vmem:[%s4531_s0 + $0x40] sm:$0xff]  ;;  %v56_v21 = vld [vmem:[%s4531_s0 + $0x48] sm:$0xff] }
   0x7   :  { %v57_v22 = vld [vmem:[%s4531_s0 + $0x50] sm:$0xff]  ;;  %v58_v23 = vld [vmem:[%s4531_s0 + $0x58] sm:$0xff]  ;;  %v59_v24 = vld [vmem:[%s4531_s0 + $0x60] sm:$0xff] }
   0x8   :  { %v60_v25 = vld [vmem:[%s4531_s0 + $0x68] sm:$0xff]  ;;  %v61_v26 = vld [vmem:[%s4531_s0 + $0x70] sm:$0xff]  ;;  %v62_v27 = vld [vmem:[%s4531_s0 + $0x78] sm:$0xff]  ;;  %s3954_s0 = smov 64  }
   0x9   :  { %3476 = vmatpush3.bf16.msra.mxu0 %v3473_v6  ;;  %v4125_v29 = vld [vmem:[%s4533_s3] ss:$0 sm:$0xff]  ;;  %s3955_s3 = smov 32   ;;  %v1452_v57 = vld [vmem:[%s4534_s4 + $0x8] sm:$0xff]  ;;  %v1453_v59 = vld [vmem:[%s4534_s4 + $0x10] sm:$0xff] }
   0xa   :  { %3478 = vmatprep.subr.bf16.mxu0 %v4041_v9  ;;  %v1451_v56 = vld [vmem:[%s4534_s4] sm:$0xff]  ;;  %v1454_v60 = vld [vmem:[%s4534_s4 + $0x18] sm:$0xff] }
   0xb   :  { %v3541_v58 = vpack.c.bf16 %v1452_v57, %v1451_v56  ;;  %v3545_v61 = vpack.c.bf16 %v1454_v60, %v1453_v59 }
   0xc   :  { %3208 = vmatmul.mubr.msk.f32.vlgmr.msra.gmra.mrb[0].mxu0 %vm74_vm0, %v48_v12 }
   0xd   :  { %3480 = vmatpush3.bf16.msra.mxu0 %v4041_v9  ;;  %3210 = vmatprep.mubr.msk.f32.mxu0 %vm74_vm0, %v49_v13 }
   0xe   :  { %3482 = vmatprep.subr.bf16.mxu0 %v4056_v14  ;;  %3542 = vmatprep.subr.bf16.mxu1 %v3541_v58 }
   0xf   :  { %3544 = vmatpush3.bf16.msra.mxu1 %v3541_v58 }
  0x10   :  { %3211 = vmatmul.mubr.msk.f32.gmra.mrb[2].mxu0 %vm74_vm0, %v50_v15  ;;  %3546 = vmatprep.subr.bf16.mxu1 %v3545_v61 }
  0x11   :  { %3213 = vmatprep.mubr.msk.f32.mxu0 %vm74_vm0, %v51_v16  ;;  %3484 = vmatpush3.bf16.msra.mxu0 %v4056_v14 }
  0x12   :  { %3486 = vmatprep.subr.bf16.mxu0 %v4041_v9 }
  0x13   :  { %3548 = vmatpush3.bf16.msra.mxu1 %v3545_v61 }
  0x14   :  { %3214 = vmatmul.mubr.msk.f32.gmra.mrb[4].mxu0 %vm74_vm0, %v52_v17 }
  0x15   :  { %3216 = vmatprep.mubr.msk.f32.mxu0 %vm74_vm0, %v53_v18 }
  0x18   :  { %3217 = vmatmul.mubr.msk.f32.gmra.mrb[6].mxu0 %vm74_vm0, %v54_v19 }
  0x19   :  { %3219 = vmatprep.mubr.msk.f32.mxu0 %vm74_vm0, %v55_v20 }
  0x1c   :  { %3220 = vmatmul.mubr.msk.f32.gmra.mrb[8].mxu0 %vm74_vm0, %v56_v21 }
  0x1d   :  { %3222 = vmatprep.mubr.msk.f32.mxu0 %vm74_vm0, %v57_v22 }
  0x20   :  { %3223 = vmatmul.mubr.msk.f32.gmra.mrb[10].mxu0 %vm74_vm0, %v58_v23 }
  0x21   :  { %3225 = vmatprep.mubr.msk.f32.mxu0 %vm74_vm0, %v59_v24 }
  0x24   :  { %3226 = vmatmul.mubr.msk.f32.gmra.mrb[12].mxu0 %vm74_vm0, %v60_v25 }
  0x25   :  { %3228 = vmatprep.mubr.msk.f32.mxu0 %vm74_vm0, %v61_v26 }
  0x28   :  { %3229 = vmatmul.mubr.msk.f32.gmra.mrb[14].mxu0 %vm74_vm0, %v62_v27 }
  0x29   :  { %3239 = vmatprep.mubr.f32.mxu0 %v3953_v28 }
  0x2c   :  { %3240 = vmatmul.mubr.f32.vlgmr.msra.gmra.mrb[0].mxu0 %v3953_v28 }
  0x2d   :  { %3488 = vmatpush3.bf16.msra.mxu0 %v4041_v9 }
  0x2e   :  { %3490 = vmatprep.subr.bf16.mxu0 %v4056_v14 }
  0x31   :  { %3492 = vmatpush3.bf16.msra.mxu0 %v4056_v14 }
  0x32   :  { %3494 = vmatprep.subr.bf16.mxu0 %v4041_v9 }
  0xff   :  { %v3241_v30 = vpop.f32.mrb[0].mxu0 }
 0x100   :  { %v359_v31 = vpop.f32.mrb[1].mxu0  ;;  %v3631_v33 = vadd.f32 %v3241_v30, %v4125_v29 }
 0x101   :  { %v3632_v32 = vadd.f32 %v4125_v29, %v359_v31 }
 0x102   :  { %v2969_v37 = vmul.f32 -1.442695, %v3631_v33 }
 0x103   :  { %3701 = vtanh.f32 %v3632_v32  ;;  %v2968_v36 = vmul.f32 -1.442695, %v3632_v32 }
 0x104   :  { %3703 = vtanh.f32 %v3631_v33 }
 0x105   :  { %3705 = vpow2.f32 %v2968_v36 }
 0x106   :  { %3707 = vpow2.f32 %v2969_v37 }
 0x10d   :  { %v3702_v34 = vpop.eup %3701 }
 0x10e   :  { %388 = vrot.lane.b32.xlu0 %v3702_v34, %s3954_s0  ;;  %v3704_v35 = vpop.eup %3703 }
 0x10f   :  { %v3706_v38 = vpop.eup %3705 }
 0x110   :  { %v376_v39 = vadd.f32 1.0, %v3706_v38  ;;  %v3708_v40 = vpop.eup %3707 }
 0x111   :  { %v377_v41 = vadd.f32 1.0, %v3708_v40 }
 0x112   :  { %390 = vrot.lane.b32.xlu0 %v3704_v35, %s3954_s0  ;;  %3709 = vrcp.f32 %v376_v39 }
 0x113   :  { %3711 = vrcp.f32 %v377_v41 }
 0x11c   :  { %v3710_v42 = vpop.eup %3709 }
 0x11d   :  { %v3712_v45 = vpop.eup %3711  ;;  %v384_v48 = vmul.f32 0.0, %v3710_v42 }
 0x11e   :  { %v385_v51 = vmul.f32 0.0, %v3712_v45 }
 0x180   :  { %v389_v43 = vpop.permute.xlu0 %388 }
 0x181   :  { %v394_v44 = vmul.f32 %v3710_v42, %v389_v43 }
 0x183   :  { %398 = vrot.lane.b32.xlu1 %v394_v44, %s3955_s3 }
 0x184   :  { %v391_v46 = vpop.permute.xlu0 %390 }
 0x185   :  { %v395_v47 = vmul.f32 %v3712_v45, %v391_v46 }
 0x187   :  { %400 = vrot.lane.b32.xlu1 %v395_v47, %s3955_s3 }
 0x1f5   :  { %v399_v49 = vpop.permute.xlu1 %398 }
 0x1f6   :  { %v4133_v50 = vadd.f32 %v399_v49, %v384_v48 }
 0x1f8   :  { %3713 = vtanh.f32 %v4133_v50 }
 0x1f9   :  { %v401_v52 = vpop.permute.xlu1 %400 }
 0x1fa   :  { %v4136_v53 = vadd.f32 %v401_v52, %v385_v51 }
 0x1fc   :  { %3715 = vtanh.f32 %v4136_v53 }
 0x202   :  { %v3714_v54 = vpop.eup %3713 }
 0x203   :  { %410 = vrot.lane.b32.xlu0 %v3714_v54, %s3954_s0 }
 0x206   :  { %v3716_v55 = vpop.eup %3715 }
 0x207   :  { %412 = vrot.lane.b32.xlu1 %v3716_v55, %s3954_s0 }
 0x275   :  { %v411_v62 = vpop.permute.xlu0 %410 }
 0x276   :  { %v416_v63 = vmul.f32 %v3710_v42, %v411_v62 }
 0x278   :  { %420 = vrot.lane.b32.xlu0 %v416_v63, %s3955_s3 }
 0x279   :  { %v413_v0 = vpop.permute.xlu1 %412 }
 0x27a   :  { %v417_v1 = vmul.f32 %v3712_v45, %v413_v0 }
 0x27c   :  { %422 = vrot.lane.b32.xlu1 %v417_v1, %s3955_s3 }
 0x2ea   :  { %v421_v2 = vpop.permute.xlu0 %420 }
 0x2eb   :  { %426 = vst.msk [vmem:[#allocation3] sm:$0xff] %vm74_vm0, %v421_v2  ;;  %3250 = vmatprep.mubr.msk.f32.mxu0 %vm74_vm0, %v421_v2 }
 0x2ee   :  { %v423_v3 = vpop.permute.xlu1 %422 }
 0x2ef   :  { %427 = vst.msk [vmem:[#allocation3 + $0x8] sm:$0xff] %vm74_vm0, %v423_v3  ;;  %3251 = vmatmul.mubr.msk.f32.vlgmr.msra.gmra.mrb[2].mxu0 %vm74_vm0, %v423_v3 }
 0x2f0   :  { %3496 = vmatpush3.bf16.msra.mxu0 %v4041_v9 }
 0x2f1   :  { %3498 = vmatprep.subr.bf16.mxu0 %v4056_v14 }
 0x2f2   :  { %v1435_v4 = vld [vmem:[#allocation3] sm:$0xff] }
 0x2f3   :  { %3327 = vmatprep.mubr.msk.f32.mxu1 %vm74_vm0, %v1435_v4 }
 0x2f4   :  { %3500 = vmatpush3.bf16.msra.mxu0 %v4056_v14 }
 0x2f5   :  { %3502 = vmatprep.subr.bf16.mxu0 %v4041_v9 }
 0x2f6   :  { %v1436_v5 = vld [vmem:[#allocation3 + $0x8] sm:$0xff] }
 0x2f7   :  { %3328 = vmatmul.mubr.msk.f32.vlgmr.msra.gmra.mrb[0].mxu1 %vm74_vm0, %v1436_v5 }
 0x3c2   :  { %v3252_v6 = vpop.f32.mrb[2].mxu0 }
 0x3c3   :  { %v3633_v7 = vadd.f32 %v3252_v6, %v4125_v29  ;;  %v500_v8 = vpop.f32.mrb[3].mxu0 }
 0x3c4   :  { %v3634_v10 = vadd.f32 %v4125_v29, %v500_v8 }
 0x3c5   :  { %3717 = vtanh.f32 %v3633_v7  ;;  %v2973_v13 = vmul.f32 -1.442695, %v3633_v7 }
 0x3c6   :  { %3719 = vtanh.f32 %v3634_v10  ;;  %v2972_v15 = vmul.f32 -1.442695, %v3634_v10 }
 0x3c7   :  { %3721 = vpow2.f32 %v2973_v13 }
 0x3c8   :  { %3723 = vpow2.f32 %v2972_v15 }
 0x3cf   :  { %v3718_v11 = vpop.eup %3717 }
 0x3d0   :  { %v3720_v12 = vpop.eup %3719  ;;  %531 = vrot.lane.b32.xlu1 %v3718_v11, %s3954_s0 }
 0x3d1   :  { %529 = vrot.lane.b32.xlu0 %v3720_v12, %s3954_s0  ;;  %v3722_v16 = vpop.eup %3721 }
 0x3d2   :  { %v3724_v17 = vpop.eup %3723  ;;  %v518_v18 = vadd.f32 1.0, %v3722_v16 }
 0x3d3   :  { %v517_v19 = vadd.f32 1.0, %v3724_v17 }
 0x3d4   :  { %3725 = vrcp.f32 %v518_v18 }
 0x3d5   :  { %3727 = vrcp.f32 %v517_v19 }
 0x3de   :  { %v3726_v20 = vpop.eup %3725 }
 0x3df   :  { %v3728_v22 = vpop.eup %3727  ;;  %v526_v26 = vmul.f32 %v3726_v20, %v4136_v53 }
 0x3e0   :  { %v525_v30 = vmul.f32 %v3728_v22, %v4133_v50 }
 0x442   :  { %v532_v21 = vpop.permute.xlu1 %531 }
 0x443   :  { %v536_v23 = vmul.f32 %v3726_v20, %v532_v21  ;;  %v530_v24 = vpop.permute.xlu0 %529 }
 0x444   :  { %v535_v25 = vmul.f32 %v3728_v22, %v530_v24 }
 0x445   :  { %541 = vrot.lane.b32.xlu1 %v536_v23, %s3955_s3 }
 0x446   :  { %539 = vrot.lane.b32.xlu0 %v535_v25, %s3955_s3 }
 0x4b7   :  { %v542_v27 = vpop.permute.xlu1 %541 }
 0x4b8   :  { %v546_v31 = vadd.f32 %v542_v27, %v526_v26  ;;  %v540_v32 = vpop.permute.xlu0 %539 }
 0x4b9   :  { %v545_v33 = vadd.f32 %v540_v32, %v525_v30 }
 0x4ba   :  { %3729 = vtanh.f32 %v546_v31 }
 0x4bb   :  { %3731 = vtanh.f32 %v545_v33 }
 0x4c4   :  { %v3730_v34 = vpop.eup %3729 }
 0x4c5   :  { %v3732_v35 = vpop.eup %3731  ;;  %553 = vrot.lane.b32.xlu1 %v3730_v34, %s3954_s0 }
 0x4c6   :  { %551 = vrot.lane.b32.xlu0 %v3732_v35, %s3954_s0 }
 0x537   :  { %v554_v36 = vpop.permute.xlu1 %553 }
 0x538   :  { %v558_v37 = vmul.f32 %v3726_v20, %v554_v36  ;;  %v552_v38 = vpop.permute.xlu0 %551 }
 0x539   :  { %v557_v39 = vmul.f32 %v3728_v22, %v552_v38 }
 0x53a   :  { %563 = vrot.lane.b32.xlu1 %v558_v37, %s3955_s3 }
 0x53b   :  { %561 = vrot.lane.b32.xlu0 %v557_v39, %s3955_s3 }
 0x5ac   :  { %v564_v40 = vpop.permute.xlu1 %563 }
 0x5ad   :  { %568 = vst.msk [vmem:[#allocation3 + $0x18] sm:$0xff] %vm74_vm0, %v564_v40  ;;  %v562_v41 = vpop.permute.xlu0 %561 }
 0x5ae   :  { %567 = vst.msk [vmem:[#allocation3 + $0x10] sm:$0xff] %vm74_vm0, %v562_v41  ;;  %3261 = vmatprep.mubr.msk.f32.mxu0 %vm74_vm0, %v562_v41 }
 0x5af   :  { %3262 = vmatmul.mubr.msk.f32.vlgmr.msra.gmra.mrb[4].mxu0 %vm74_vm0, %v564_v40 }
 0x5b0   :  { %3504 = vmatpush3.bf16.msra.mxu0 %v4041_v9 }
 0x5b1   :  { %3506 = vmatprep.subr.bf16.mxu0 %v4056_v14 }
 0x5b4   :  { %3508 = vmatpush3.bf16.msra.mxu0 %v4056_v14  ;;  %v1438_v43 = vld [vmem:[#allocation3 + $0x18] sm:$0xff] }
 0x5b5   :  { %v1437_v42 = vld [vmem:[#allocation3 + $0x10] sm:$0xff]  ;;  %3510 = vmatprep.subr.bf16.mxu0 %v4041_v9 }
 0x5b6   :  { %3330 = vmatprep.mubr.msk.f32.mxu1 %vm74_vm0, %v1437_v42 }
 0x5b7   :  { %3331 = vmatmul.mubr.msk.f32.gmra.mrb[2].mxu1 %vm74_vm0, %v1438_v43 }
 0x682   :  { %v3263_v44 = vpop.f32.mrb[4].mxu0 }
 0x683   :  { %v3635_v45 = vadd.f32 %v3263_v44, %v4125_v29  ;;  %v641_v46 = vpop.f32.mrb[5].mxu0 }
 0x684   :  { %v3636_v47 = vadd.f32 %v4125_v29, %v641_v46 }
 0x685   :  { %3733 = vtanh.f32 %v3635_v45  ;;  %v2977_v50 = vmul.f32 -1.442695, %v3635_v45 }
 0x686   :  { %3735 = vtanh.f32 %v3636_v47  ;;  %v2976_v51 = vmul.f32 -1.442695, %v3636_v47 }
 0x687   :  { %3737 = vpow2.f32 %v2977_v50 }
 0x688   :  { %3739 = vpow2.f32 %v2976_v51 }
 0x68f   :  { %v3734_v48 = vpop.eup %3733 }
 0x690   :  { %v3736_v49 = vpop.eup %3735  ;;  %672 = vrot.lane.b32.xlu1 %v3734_v48, %s3954_s0 }
 0x691   :  { %670 = vrot.lane.b32.xlu0 %v3736_v49, %s3954_s0  ;;  %v3738_v52 = vpop.eup %3737 }
 0x692   :  { %v3740_v53 = vpop.eup %3739  ;;  %v659_v54 = vadd.f32 1.0, %v3738_v52 }
 0x693   :  { %v658_v55 = vadd.f32 1.0, %v3740_v53 }
 0x694   :  { %3741 = vrcp.f32 %v659_v54 }
 0x695   :  { %3743 = vrcp.f32 %v658_v55 }
 0x69e   :  { %v3742_v56 = vpop.eup %3741 }
 0x69f   :  { %v3744_v58 = vpop.eup %3743  ;;  %v667_v62 = vmul.f32 %v3742_v56, %v546_v31 }
 0x6a0   :  { %v666_v0 = vmul.f32 %v3744_v58, %v545_v33 }
 0x702   :  { %v673_v57 = vpop.permute.xlu1 %672 }
 0x703   :  { %v677_v59 = vmul.f32 %v3742_v56, %v673_v57  ;;  %v671_v60 = vpop.permute.xlu0 %670 }
 0x704   :  { %v676_v61 = vmul.f32 %v3744_v58, %v671_v60 }
 0x705   :  { %682 = vrot.lane.b32.xlu1 %v677_v59, %s3955_s3 }
 0x706   :  { %680 = vrot.lane.b32.xlu0 %v676_v61, %s3955_s3 }
 0x777   :  { %v683_v63 = vpop.permute.xlu1 %682 }
 0x778   :  { %v687_v1 = vadd.f32 %v683_v63, %v667_v62  ;;  %v681_v2 = vpop.permute.xlu0 %680 }
 0x779   :  { %v686_v3 = vadd.f32 %v681_v2, %v666_v0 }
 0x77a   :  { %3745 = vtanh.f32 %v687_v1 }
 0x77b   :  { %3747 = vtanh.f32 %v686_v3 }
 0x784   :  { %v3746_v4 = vpop.eup %3745 }
 0x785   :  { %v3748_v5 = vpop.eup %3747  ;;  %694 = vrot.lane.b32.xlu1 %v3746_v4, %s3954_s0 }
 0x786   :  { %692 = vrot.lane.b32.xlu0 %v3748_v5, %s3954_s0 }
 0x7f7   :  { %v695_v6 = vpop.permute.xlu1 %694 }
 0x7f8   :  { %v699_v7 = vmul.f32 %v3742_v56, %v695_v6  ;;  %v693_v8 = vpop.permute.xlu0 %692 }
 0x7f9   :  { %v698_v10 = vmul.f32 %v3744_v58, %v693_v8 }
 0x7fa   :  { %704 = vrot.lane.b32.xlu1 %v699_v7, %s3955_s3 }
 0x7fb   :  { %702 = vrot.lane.b32.xlu0 %v698_v10, %s3955_s3 }
 0x86c   :  { %v705_v11 = vpop.permute.xlu1 %704 }
 0x86d   :  { %709 = vst.msk [vmem:[#allocation3 + $0x28] sm:$0xff] %vm74_vm0, %v705_v11  ;;  %v703_v12 = vpop.permute.xlu0 %702 }
 0x86e   :  { %708 = vst.msk [vmem:[#allocation3 + $0x20] sm:$0xff] %vm74_vm0, %v703_v12  ;;  %3272 = vmatprep.mubr.msk.f32.mxu0 %vm74_vm0, %v703_v12 }
 0x86f   :  { %3273 = vmatmul.mubr.msk.f32.vlgmr.msra.gmra.mrb[6].mxu0 %vm74_vm0, %v705_v11 }
 0x870   :  { %3512 = vmatpush3.bf16.msra.mxu0 %v4041_v9 }
 0x871   :  { %3514 = vmatprep.subr.bf16.mxu0 %v4056_v14 }
 0x874   :  { %3516 = vmatpush3.bf16.msra.mxu0 %v4056_v14  ;;  %v1440_v15 = vld [vmem:[#allocation3 + $0x28] sm:$0xff] }
 0x875   :  { %v1439_v13 = vld [vmem:[#allocation3 + $0x20] sm:$0xff]  ;;  %3518 = vmatprep.subr.bf16.mxu0 %v4041_v9 }
 0x876   :  { %3333 = vmatprep.mubr.msk.f32.mxu1 %vm74_vm0, %v1439_v13 }
 0x877   :  { %3334 = vmatmul.mubr.msk.f32.gmra.mrb[4].mxu1 %vm74_vm0, %v1440_v15 }
 0x942   :  { %v3274_v16 = vpop.f32.mrb[6].mxu0 }
 0x943   :  { %v3637_v17 = vadd.f32 %v3274_v16, %v4125_v29  ;;  %v782_v18 = vpop.f32.mrb[7].mxu0 }
 0x944   :  { %v3638_v19 = vadd.f32 %v4125_v29, %v782_v18 }
 0x945   :  { %3749 = vtanh.f32 %v3637_v17  ;;  %v2981_v22 = vmul.f32 -1.442695, %v3637_v17 }
 0x946   :  { %3751 = vtanh.f32 %v3638_v19  ;;  %v2980_v23 = vmul.f32 -1.442695, %v3638_v19 }
 0x947   :  { %3753 = vpow2.f32 %v2981_v22 }
 0x948   :  { %3755 = vpow2.f32 %v2980_v23 }
 0x94f   :  { %v3750_v20 = vpop.eup %3749 }
 0x950   :  { %v3752_v21 = vpop.eup %3751  ;;  %813 = vrot.lane.b32.xlu1 %v3750_v20, %s3954_s0 }
 0x951   :  { %811 = vrot.lane.b32.xlu0 %v3752_v21, %s3954_s0  ;;  %v3754_v24 = vpop.eup %3753 }
 0x952   :  { %v3756_v25 = vpop.eup %3755  ;;  %v800_v26 = vadd.f32 1.0, %v3754_v24 }
 0x953   :  { %v799_v27 = vadd.f32 1.0, %v3756_v25 }
 0x954   :  { %3757 = vrcp.f32 %v800_v26 }
 0x955   :  { %3759 = vrcp.f32 %v799_v27 }
 0x95e   :  { %v3758_v30 = vpop.eup %3757 }
 0x95f   :  { %v3760_v32 = vpop.eup %3759  ;;  %v808_v36 = vmul.f32 %v3758_v30, %v687_v1 }
 0x960   :  { %v807_v38 = vmul.f32 %v3760_v32, %v686_v3 }
 0x9c2   :  { %v814_v31 = vpop.permute.xlu1 %813 }
 0x9c3   :  { %v818_v33 = vmul.f32 %v3758_v30, %v814_v31  ;;  %v812_v34 = vpop.permute.xlu0 %811 }
 0x9c4   :  { %v817_v35 = vmul.f32 %v3760_v32, %v812_v34 }
 0x9c5   :  { %823 = vrot.lane.b32.xlu1 %v818_v33, %s3955_s3 }
 0x9c6   :  { %821 = vrot.lane.b32.xlu0 %v817_v35, %s3955_s3 }
 0xa37   :  { %v824_v37 = vpop.permute.xlu1 %823 }
 0xa38   :  { %v828_v39 = vadd.f32 %v824_v37, %v808_v36  ;;  %v822_v40 = vpop.permute.xlu0 %821 }
 0xa39   :  { %v827_v41 = vadd.f32 %v822_v40, %v807_v38 }
 0xa3a   :  { %3761 = vtanh.f32 %v828_v39 }
 0xa3b   :  { %3763 = vtanh.f32 %v827_v41 }
 0xa44   :  { %v3762_v42 = vpop.eup %3761 }
 0xa45   :  { %v3764_v43 = vpop.eup %3763  ;;  %835 = vrot.lane.b32.xlu1 %v3762_v42, %s3954_s0 }
 0xa46   :  { %833 = vrot.lane.b32.xlu0 %v3764_v43, %s3954_s0 }
 0xab7   :  { %v836_v44 = vpop.permute.xlu1 %835 }
 0xab8   :  { %v840_v45 = vmul.f32 %v3758_v30, %v836_v44  ;;  %v834_v46 = vpop.permute.xlu0 %833 }
 0xab9   :  { %v839_v47 = vmul.f32 %v3760_v32, %v834_v46 }
 0xaba   :  { %845 = vrot.lane.b32.xlu1 %v840_v45, %s3955_s3 }
 0xabb   :  { %843 = vrot.lane.b32.xlu0 %v839_v47, %s3955_s3 }
 0xb2c   :  { %v846_v48 = vpop.permute.xlu1 %845 }
 0xb2d   :  { %850 = vst.msk [vmem:[#allocation3 + $0x38] sm:$0xff] %vm74_vm0, %v846_v48  ;;  %v844_v49 = vpop.permute.xlu0 %843 }
 0xb2e   :  { %849 = vst.msk [vmem:[#allocation3 + $0x30] sm:$0xff] %vm74_vm0, %v844_v49  ;;  %3283 = vmatprep.mubr.msk.f32.mxu0 %vm74_vm0, %v844_v49 }
 0xb2f   :  { %3284 = vmatmul.mubr.msk.f32.vlgmr.msra.gmra.mrb[8].mxu0 %vm74_vm0, %v846_v48 }
 0xb30   :  { %3520 = vmatpush3.bf16.msra.mxu0 %v4041_v9 }
 0xb31   :  { %3522 = vmatprep.subr.bf16.mxu0 %v4056_v14 }
 0xb34   :  { %3524 = vmatpush3.bf16.msra.mxu0 %v4056_v14  ;;  %v1442_v51 = vld [vmem:[#allocation3 + $0x38] sm:$0xff] }
 0xb35   :  { %v1441_v50 = vld [vmem:[#allocation3 + $0x30] sm:$0xff]  ;;  %3526 = vmatprep.subr.bf16.mxu0 %v4041_v9 }
 0xb36   :  { %3336 = vmatprep.mubr.msk.f32.mxu1 %vm74_vm0, %v1441_v50 }
 0xb37   :  { %3337 = vmatmul.mubr.msk.f32.gmra.mrb[6].mxu1 %vm74_vm0, %v1442_v51 }
 0xc02   :  { %v3285_v52 = vpop.f32.mrb[8].mxu0 }
 0xc03   :  { %v3639_v53 = vadd.f32 %v3285_v52, %v4125_v29  ;;  %v923_v54 = vpop.f32.mrb[9].mxu0 }
 0xc04   :  { %v3640_v55 = vadd.f32 %v4125_v29, %v923_v54 }
 0xc05   :  { %3765 = vtanh.f32 %v3639_v53  ;;  %v2985_v58 = vmul.f32 -1.442695, %v3639_v53 }
 0xc06   :  { %3767 = vtanh.f32 %v3640_v55  ;;  %v2984_v59 = vmul.f32 -1.442695, %v3640_v55 }
 0xc07   :  { %3769 = vpow2.f32 %v2985_v58 }
 0xc08   :  { %3771 = vpow2.f32 %v2984_v59 }
 0xc0f   :  { %v3766_v56 = vpop.eup %3765 }
 0xc10   :  { %v3768_v57 = vpop.eup %3767  ;;  %954 = vrot.lane.b32.xlu1 %v3766_v56, %s3954_s0 }
 0xc11   :  { %952 = vrot.lane.b32.xlu0 %v3768_v57, %s3954_s0  ;;  %v3770_v60 = vpop.eup %3769 }
 0xc12   :  { %v3772_v61 = vpop.eup %3771  ;;  %v941_v62 = vadd.f32 1.0, %v3770_v60 }
 0xc13   :  { %v940_v63 = vadd.f32 1.0, %v3772_v61 }
 0xc14   :  { %3773 = vrcp.f32 %v941_v62 }
 0xc15   :  { %3775 = vrcp.f32 %v940_v63 }
 0xc1e   :  { %v3774_v0 = vpop.eup %3773 }
 0xc1f   :  { %v3776_v2 = vpop.eup %3775  ;;  %v949_v6 = vmul.f32 %v3774_v0, %v828_v39 }
 0xc20   :  { %v948_v8 = vmul.f32 %v3776_v2, %v827_v41 }
 0xc82   :  { %v955_v1 = vpop.permute.xlu1 %954 }
 0xc83   :  { %v959_v3 = vmul.f32 %v3774_v0, %v955_v1  ;;  %v953_v4 = vpop.permute.xlu0 %952 }
 0xc84   :  { %v958_v5 = vmul.f32 %v3776_v2, %v953_v4 }
 0xc85   :  { %964 = vrot.lane.b32.xlu1 %v959_v3, %s3955_s3 }
 0xc86   :  { %962 = vrot.lane.b32.xlu0 %v958_v5, %s3955_s3 }
 0xcf7   :  { %v965_v7 = vpop.permute.xlu1 %964 }
 0xcf8   :  { %v969_v10 = vadd.f32 %v965_v7, %v949_v6  ;;  %v963_v11 = vpop.permute.xlu0 %962 }
 0xcf9   :  { %v968_v12 = vadd.f32 %v963_v11, %v948_v8 }
 0xcfa   :  { %3777 = vtanh.f32 %v969_v10 }
 0xcfb   :  { %3779 = vtanh.f32 %v968_v12 }
 0xd04   :  { %v3778_v13 = vpop.eup %3777 }
 0xd05   :  { %v3780_v15 = vpop.eup %3779  ;;  %976 = vrot.lane.b32.xlu1 %v3778_v13, %s3954_s0 }
 0xd06   :  { %974 = vrot.lane.b32.xlu0 %v3780_v15, %s3954_s0 }
 0xd77   :  { %v977_v16 = vpop.permute.xlu1 %976 }
 0xd78   :  { %v981_v17 = vmul.f32 %v3774_v0, %v977_v16  ;;  %v975_v18 = vpop.permute.xlu0 %974 }
 0xd79   :  { %v980_v19 = vmul.f32 %v3776_v2, %v975_v18 }
 0xd7a   :  { %986 = vrot.lane.b32.xlu1 %v981_v17, %s3955_s3 }
 0xd7b   :  { %984 = vrot.lane.b32.xlu0 %v980_v19, %s3955_s3 }
 0xdec   :  { %v987_v20 = vpop.permute.xlu1 %986 }
 0xded   :  { %991 = vst.msk [vmem:[#allocation3 + $0x48] sm:$0xff] %vm74_vm0, %v987_v20  ;;  %v985_v21 = vpop.permute.xlu0 %984 }
 0xdee   :  { %990 = vst.msk [vmem:[#allocation3 + $0x40] sm:$0xff] %vm74_vm0, %v985_v21  ;;  %3294 = vmatprep.mubr.msk.f32.mxu0 %vm74_vm0, %v985_v21 }
 0xdef   :  { %3295 = vmatmul.mubr.msk.f32.vlgmr.msra.gmra.mrb[10].mxu0 %vm74_vm0, %v987_v20 }
 0xdf0   :  { %3528 = vmatpush3.bf16.msra.mxu0 %v4041_v9 }
 0xdf1   :  { %3530 = vmatprep.subr.bf16.mxu0 %v4056_v14 }
 0xdf4   :  { %3532 = vmatpush3.bf16.msra.mxu0 %v4056_v14  ;;  %v1444_v23 = vld [vmem:[#allocation3 + $0x48] sm:$0xff] }
 0xdf5   :  { %v1443_v22 = vld [vmem:[#allocation3 + $0x40] sm:$0xff]  ;;  %3534 = vmatprep.subr.bf16.mxu0 %v4041_v9 }
 0xdf6   :  { %3339 = vmatprep.mubr.msk.f32.mxu1 %vm74_vm0, %v1443_v22 }
 0xdf7   :  { %3340 = vmatmul.mubr.msk.f32.gmra.mrb[8].mxu1 %vm74_vm0, %v1444_v23 }
 0xec2   :  { %v3296_v24 = vpop.f32.mrb[10].mxu0 }
 0xec3   :  { %v3641_v25 = vadd.f32 %v3296_v24, %v4125_v29  ;;  %v1064_v26 = vpop.f32.mrb[11].mxu0 }
 0xec4   :  { %v3642_v27 = vadd.f32 %v4125_v29, %v1064_v26 }
 0xec5   :  { %3781 = vtanh.f32 %v3641_v25  ;;  %v2989_v32 = vmul.f32 -1.442695, %v3641_v25 }
 0xec6   :  { %3783 = vtanh.f32 %v3642_v27  ;;  %v2988_v33 = vmul.f32 -1.442695, %v3642_v27 }
 0xec7   :  { %3785 = vpow2.f32 %v2989_v32 }
 0xec8   :  { %3787 = vpow2.f32 %v2988_v33 }
 0xecf   :  { %v3782_v30 = vpop.eup %3781 }
 0xed0   :  { %v3784_v31 = vpop.eup %3783  ;;  %1095 = vrot.lane.b32.xlu1 %v3782_v30, %s3954_s0 }
 0xed1   :  { %1093 = vrot.lane.b32.xlu0 %v3784_v31, %s3954_s0  ;;  %v3786_v34 = vpop.eup %3785 }
 0xed2   :  { %v3788_v35 = vpop.eup %3787  ;;  %v1082_v36 = vadd.f32 1.0, %v3786_v34 }
 0xed3   :  { %v1081_v37 = vadd.f32 1.0, %v3788_v35 }
 0xed4   :  { %3789 = vrcp.f32 %v1082_v36 }
 0xed5   :  { %3791 = vrcp.f32 %v1081_v37 }
 0xede   :  { %v3790_v38 = vpop.eup %3789 }
 0xedf   :  { %v3792_v40 = vpop.eup %3791  ;;  %v1090_v44 = vmul.f32 %v3790_v38, %v969_v10 }
 0xee0   :  { %v1089_v46 = vmul.f32 %v3792_v40, %v968_v12 }
 0xf42   :  { %v1096_v39 = vpop.permute.xlu1 %1095 }
 0xf43   :  { %v1100_v41 = vmul.f32 %v3790_v38, %v1096_v39  ;;  %v1094_v42 = vpop.permute.xlu0 %1093 }
 0xf44   :  { %v1099_v43 = vmul.f32 %v3792_v40, %v1094_v42 }
 0xf45   :  { %1105 = vrot.lane.b32.xlu1 %v1100_v41, %s3955_s3 }
 0xf46   :  { %1103 = vrot.lane.b32.xlu0 %v1099_v43, %s3955_s3 }
 0xfb7   :  { %v1106_v45 = vpop.permute.xlu1 %1105 }
 0xfb8   :  { %v4253_v47 = vadd.f32 %v1106_v45, %v1090_v44  ;;  %v1104_v48 = vpop.permute.xlu0 %1103 }
 0xfb9   :  { %v4255_v49 = vadd.f32 %v1104_v48, %v1089_v46 }
 0xfba   :  { %3793 = vtanh.f32 %v4253_v47 }
 0xfbb   :  { %3795 = vtanh.f32 %v4255_v49 }
 0xfc4   :  { %v3794_v50 = vpop.eup %3793 }
 0xfc5   :  { %v3796_v51 = vpop.eup %3795  ;;  %1117 = vrot.lane.b32.xlu1 %v3794_v50, %s3954_s0 }
 0xfc6   :  { %1115 = vrot.lane.b32.xlu0 %v3796_v51, %s3954_s0 }
0x1037   :  { %v1118_v52 = vpop.permute.xlu1 %1117 }
0x1038   :  { %v4261_v53 = vmul.f32 %v3790_v38, %v1118_v52  ;;  %v1116_v54 = vpop.permute.xlu0 %1115 }
0x1039   :  { %v1121_v55 = vmul.f32 %v3792_v40, %v1116_v54 }
0x103a   :  { %1127 = vrot.lane.b32.xlu1 %v4261_v53, %s3955_s3 }
0x103b   :  { %1125 = vrot.lane.b32.xlu0 %v1121_v55, %s3955_s3  ;;  %v1274_v25 = vmul.f32 0.0, %v1121_v55 }
0x10ac   :  { %v1128_v56 = vpop.permute.xlu1 %1127 }
0x10ad   :  { %1132 = vst.msk [vmem:[#allocation3 + $0x58] sm:$0xff] %vm74_vm0, %v1128_v56  ;;  %v1126_v57 = vpop.permute.xlu0 %1125 }
0x10ae   :  { %1131 = vst.msk [vmem:[#allocation3 + $0x50] sm:$0xff] %vm74_vm0, %v1126_v57  ;;  %3305 = vmatprep.mubr.msk.f32.mxu0 %vm74_vm0, %v1126_v57 }
0x10af   :  { %3306 = vmatmul.mubr.msk.f32.vlgmr.msra.gmra.mrb[12].mxu0 %vm74_vm0, %v1128_v56  ;;  %v1268_v56 = vmul.f32 0.0, %v4255_v49 }
0x10b0   :  { %3536 = vmatpush3.bf16.msra.mxu0 %v4041_v9 }
0x10b1   :  { %3538 = vmatprep.subr.bf16.mxu0 %v4056_v14 }
0x10b4   :  { %3540 = vmatpush3.bf16.msra.mxu0 %v4056_v14  ;;  %v1446_v59 = vld [vmem:[#allocation3 + $0x58] sm:$0xff] }
0x10b5   :  { %v1445_v58 = vld [vmem:[#allocation3 + $0x50] sm:$0xff] }
0x10b6   :  { %3342 = vmatprep.mubr.msk.f32.mxu1 %vm74_vm0, %v1445_v58 }
0x10b7   :  { %3343 = vmatmul.mubr.msk.f32.gmra.mrb[10].mxu1 %vm74_vm0, %v1446_v59 }
0x1182   :  { %v3307_v60 = vpop.f32.mrb[12].mxu0 }
0x1183   :  { %v3643_v61 = vadd.f32 %v3307_v60, %v4125_v29  ;;  %v1205_v62 = vpop.f32.mrb[13].mxu0 }
0x1184   :  { %v3644_v63 = vadd.f32 %v4125_v29, %v1205_v62 }
0x1185   :  { %3797 = vtanh.f32 %v3643_v61  ;;  %v2993_v14 = vmul.f32 -1.442695, %v3643_v61 }
0x1186   :  { %3799 = vtanh.f32 %v3644_v63  ;;  %v2992_v1 = vmul.f32 -1.442695, %v3644_v63 }
0x1187   :  { %3801 = vpow2.f32 %v2993_v14  ;;  %v1672_v14 = vld [vmem:[%s4535_s5 + $0x8] sm:$0xff] }
0x1188   :  { %3803 = vpow2.f32 %v2992_v1  ;;  %v1674_v1 = vld [vmem:[%s4535_s5 + $0x18] sm:$0xff] }
0x118f   :  { %v3798_v0 = vpop.eup %3797 }
0x1190   :  { %v3800_v9 = vpop.eup %3799  ;;  %1236 = vrot.lane.b32.xlu0 %v3798_v0, %s3954_s0 }
0x1191   :  { %1234 = vrot.lane.b32.xlu1 %v3800_v9, %s3954_s0  ;;  %v3802_v2 = vpop.eup %3801  ;;  %v1671_v9 = vld [vmem:[%s4535_s5] sm:$0xff] }
0x1192   :  { %v3804_v3 = vpop.eup %3803  ;;  %v1223_v4 = vadd.f32 1.0, %v3802_v2 }
0x1193   :  { %v1222_v5 = vadd.f32 1.0, %v3804_v3 }
0x1194   :  { %3805 = vrcp.f32 %v1223_v4 }
0x1195   :  { %3807 = vrcp.f32 %v1222_v5 }
0x119e   :  { %v3806_v6 = vpop.eup %3805 }
0x119f   :  { %v3808_v8 = vpop.eup %3807  ;;  %v1231_v13 = vmul.f32 %v3806_v6, %v4253_v47 }
0x11a0   :  { %v1230_v16 = vmul.f32 %v3808_v8, %v4255_v49  ;;  %v4317_v49 = vpack.c.bf16 %v1672_v14, %v1671_v9 }
0x11a2   :  { %3550 = vmatprep.subr.bf16.mxu1 %v4317_v49 }
0x11a3   :  { %3552 = vmatpush3.bf16.msra.mxu1 %v4317_v49 }
0x1202   :  { %v1237_v7 = vpop.permute.xlu0 %1236 }
0x1203   :  { %v1241_v10 = vmul.f32 %v3806_v6, %v1237_v7  ;;  %v1235_v11 = vpop.permute.xlu1 %1234 }
0x1204   :  { %v1240_v12 = vmul.f32 %v3808_v8, %v1235_v11 }
0x1205   :  { %1246 = vrot.lane.b32.xlu0 %v1241_v10, %s3955_s3 }
0x1206   :  { %1244 = vrot.lane.b32.xlu1 %v1240_v12, %s3955_s3 }
0x1277   :  { %v1247_v15 = vpop.permute.xlu0 %1246 }
0x1278   :  { %v1251_v17 = vadd.f32 %v1247_v15, %v1231_v13  ;;  %v1245_v18 = vpop.permute.xlu1 %1244 }
0x1279   :  { %v1250_v19 = vadd.f32 %v1245_v18, %v1230_v16 }
0x127a   :  { %3809 = vtanh.f32 %v1251_v17  ;;  %v1265_v55 = vmul.f32 0.0, %v1251_v17 }
0x127b   :  { %3811 = vtanh.f32 %v1250_v19  ;;  %v1270_v58 = vadd.f32 %v1268_v56, %v1250_v19  ;;  %v4348_v19 = vld [vmem:[%s4536_s6] ss:$0 sm:$0xff] }
0x127c   :  { %v1271_v57 = vadd.f32 %v1265_v55, %v4253_v47  ;;  %v1673_v47 = vld [vmem:[%s4535_s5 + $0x10] sm:$0xff] }
0x127d   :  { %v4322_v2 = vpack.c.bf16 %v1674_v1, %v1673_v47 }
0x127f   :  { %3554 = vmatprep.subr.bf16.mxu1 %v4322_v2 }
0x1280   :  { %3556 = vmatpush3.bf16.msra.mxu1 %v4322_v2 }
0x1281   :  { %3558 = vmatprep.subr.bf16.mxu1 %v4317_v49 }
0x1284   :  { %v3810_v20 = vpop.eup %3809 }
0x1285   :  { %v3812_v21 = vpop.eup %3811  ;;  %1258 = vrot.lane.b32.xlu0 %v3810_v20, %s3954_s0 }
0x1286   :  { %1256 = vrot.lane.b32.xlu1 %v3812_v21, %s3954_s0 }
0x12f7   :  { %v1259_v22 = vpop.permute.xlu0 %1258 }
0x12f8   :  { %v1263_v23 = vmul.f32 %v3806_v6, %v1259_v22  ;;  %v1257_v24 = vpop.permute.xlu1 %1256 }
0x12f9   :  { %v1262_v26 = vmul.f32 %v3808_v8, %v1257_v24 }
0x12fa   :  { %v1273_v27 = vmul.f32 0.0, %v1263_v23 }
0x12fb   :  { %v4285_v30 = vadd.f32 %v1274_v25, %v1262_v26 }
0x12fc   :  { %v4288_v31 = vadd.f32 %v1273_v27, %v4261_v53 }
0x12fd   :  { %1280 = vrot.lane.b32.xlu0 %v4285_v30, %s3955_s3  ;;  %v1421_v10 = vmul.f32 0.0, %v4285_v30 }
0x12fe   :  { %1282 = vrot.lane.b32.xlu1 %v4288_v31, %s3955_s3 }
0x136f   :  { %v1281_v32 = vpop.permute.xlu0 %1280 }
0x1370   :  { %1286 = vst.msk [vmem:[#allocation3 + $0x60] sm:$0xff] %vm74_vm0, %v1281_v32  ;;  %v1283_v33 = vpop.permute.xlu1 %1282  ;;  %3316 = vmatprep.mubr.msk.f32.mxu0 %vm74_vm0, %v1281_v32 }
0x1371   :  { %1287 = vst.msk [vmem:[#allocation3 + $0x68] sm:$0xff] %vm74_vm0, %v1283_v33  ;;  %3317 = vmatmul.mubr.msk.f32.vlgmr.msra.gmra.mrb[14].mxu0 %vm74_vm0, %v1283_v33 }
0x1372   :  { %3455 = vmatprep.mubr.msk.f32.mxu0 %vm3957_vm1, %v3953_v28 }
0x1377   :  { %v1447_v34 = vld [vmem:[#allocation3 + $0x60] sm:$0xff] }
0x1378   :  { %3345 = vmatprep.mubr.msk.f32.mxu1 %vm74_vm0, %v1447_v34  ;;  %v1448_v35 = vld [vmem:[#allocation3 + $0x68] sm:$0xff] }
0x1379   :  { %3346 = vmatmul.mubr.msk.f32.gmra.mrb[12].mxu1 %vm74_vm0, %v1448_v35 }
0x1444   :  { %v3318_v36 = vpop.f32.mrb[14].mxu0 }
0x1445   :  { %v3645_v37 = vadd.f32 %v3318_v36, %v4125_v29  ;;  %v1360_v38 = vpop.f32.mrb[15].mxu0 }
0x1446   :  { %v3646_v39 = vadd.f32 %v4125_v29, %v1360_v38 }
0x1447   :  { %3813 = vtanh.f32 %v3645_v37  ;;  %v2997_v42 = vmul.f32 -1.442695, %v3645_v37 }
0x1448   :  { %3815 = vtanh.f32 %v3646_v39  ;;  %v2996_v43 = vmul.f32 -1.442695, %v3646_v39 }
0x1449   :  { %3817 = vpow2.f32 %v2997_v42 }
0x144a   :  { %3819 = vpow2.f32 %v2996_v43 }
0x1451   :  { %v3814_v40 = vpop.eup %3813 }
0x1452   :  { %v3816_v41 = vpop.eup %3815  ;;  %1391 = vrot.lane.b32.xlu0 %v3814_v40, %s3954_s0 }
0x1453   :  { %1389 = vrot.lane.b32.xlu1 %v3816_v41, %s3954_s0  ;;  %v3818_v44 = vpop.eup %3817 }
0x1454   :  { %v3820_v45 = vpop.eup %3819  ;;  %v1378_v46 = vadd.f32 1.0, %v3818_v44 }
0x1455   :  { %v1377_v48 = vadd.f32 1.0, %v3820_v45 }
0x1456   :  { %3821 = vrcp.f32 %v1378_v46 }
0x1457   :  { %3823 = vrcp.f32 %v1377_v48 }
0x1460   :  { %v3822_v50 = vpop.eup %3821 }
0x1461   :  { %v3824_v51 = vpop.eup %3823  ;;  %v1386_v59 = vmul.f32 %v3822_v50, %v1271_v57 }
0x1462   :  { %v1385_v61 = vmul.f32 %v3824_v51, %v1270_v58 }
0x14c4   :  { %v1392_v29 = vpop.permute.xlu0 %1391 }
0x14c5   :  { %v1396_v52 = vmul.f32 %v3822_v50, %v1392_v29  ;;  %v1390_v53 = vpop.permute.xlu1 %1389 }
0x14c6   :  { %v1395_v54 = vmul.f32 %v3824_v51, %v1390_v53 }
0x14c7   :  { %1401 = vrot.lane.b32.xlu0 %v1396_v52, %s3955_s3 }
0x14c8   :  { %1399 = vrot.lane.b32.xlu1 %v1395_v54, %s3955_s3 }
0x1539   :  { %v1402_v60 = vpop.permute.xlu0 %1401 }
0x153a   :  { %v1406_v62 = vadd.f32 %v1402_v60, %v1386_v59  ;;  %v1400_v63 = vpop.permute.xlu1 %1399 }
0x153b   :  { %v1405_v0 = vadd.f32 %v1400_v63, %v1385_v61 }
0x153c   :  { %3825 = vtanh.f32 %v1406_v62 }
0x153d   :  { %3827 = vtanh.f32 %v1405_v0 }
0x1546   :  { %v3826_v3 = vpop.eup %3825 }
0x1547   :  { %v3828_v4 = vpop.eup %3827  ;;  %1413 = vrot.lane.b32.xlu0 %v3826_v3, %s3954_s0 }
0x1548   :  { %1411 = vrot.lane.b32.xlu1 %v3828_v4, %s3954_s0 }
0x15b9   :  { %v1414_v5 = vpop.permute.xlu0 %1413 }
0x15ba   :  { %v1418_v6 = vmul.f32 %v3822_v50, %v1414_v5  ;;  %v1412_v7 = vpop.permute.xlu1 %1411 }
0x15bb   :  { %v1417_v8 = vmul.f32 %v3824_v51, %v1412_v7 }
0x15bc   :  { %v1420_v11 = vmul.f32 0.0, %v1418_v6 }
0x15bd   :  { %v1423_v12 = vadd.f32 %v1421_v10, %v1417_v8 }
0x15be   :  { %v1424_v13 = vadd.f32 %v1420_v11, %v4288_v31 }
0x15bf   :  { %1427 = vrot.lane.b32.xlu0 %v1423_v12, %s3955_s3 }
0x15c0   :  { %1429 = vrot.lane.b32.xlu1 %v1424_v13, %s3955_s3 }
0x1631   :  { %v1428_v15 = vpop.permute.xlu0 %1427 }
0x1632   :  { %1433 = vst.msk [vmem:[#allocation3 + $0x70] sm:$0xff] %vm74_vm0, %v1428_v15  ;;  %v1430_v16 = vpop.permute.xlu1 %1429 }
0x1633   :  { %1434 = vst.msk [vmem:[#allocation3 + $0x78] sm:$0xff] %vm74_vm0, %v1430_v16 }
0x1639   :  { %v1449_v17 = vld [vmem:[#allocation3 + $0x70] sm:$0xff] }
0x163a   :  { %3348 = vmatprep.mubr.msk.f32.mxu1 %vm74_vm0, %v1449_v17  ;;  %v1450_v18 = vld [vmem:[#allocation3 + $0x78] sm:$0xff] }
0x163b   :  { %3349 = vmatmul.mubr.msk.f32.gmra.mrb[14].mxu1 %vm74_vm0, %v1450_v18 }
0x163c   :  { %3359 = vmatprep.mubr.f32.mxu1 %v3953_v28 }
0x163f   :  { %3360 = vmatmul.mubr.f32.vlgmr.msra.gmra.mrb[0].mxu1 %v3953_v28 }
0x1640   :  { %3560 = vmatpush3.bf16.msra.mxu1 %v4317_v49 }
0x1641   :  { %3562 = vmatprep.subr.bf16.mxu1 %v4322_v2 }
0x1644   :  { %3564 = vmatpush3.bf16.msra.mxu1 %v4322_v2 }
0x1645   :  { %3566 = vmatprep.subr.bf16.mxu1 %v4317_v49 }
0x1712   :  { %v3361_v20 = vpop.f32.mrb[0].mxu1 }
0x1713   :  { %v3647_v21 = vadd.f32 %v3361_v20, %v4348_v19  ;;  %v1743_v22 = vpop.f32.mrb[1].mxu1 }
0x1714   :  { %v3648_v23 = vadd.f32 %v4348_v19, %v1743_v22 }
0x1715   :  { %3829 = vtanh.f32 %v3647_v21  ;;  %v3016_v26 = vmul.f32 -1.442695, %v3647_v21 }
0x1716   :  { %3831 = vtanh.f32 %v3648_v23  ;;  %v3015_v27 = vmul.f32 -1.442695, %v3648_v23 }
0x1717   :  { %3833 = vpow2.f32 %v3016_v26 }
0x1718   :  { %3835 = vpow2.f32 %v3015_v27 }
0x171f   :  { %v3830_v24 = vpop.eup %3829 }
0x1720   :  { %v3832_v25 = vpop.eup %3831  ;;  %1774 = vrot.lane.b32.xlu1 %v3830_v24, %s3954_s0 }
0x1721   :  { %1772 = vrot.lane.b32.xlu0 %v3832_v25, %s3954_s0  ;;  %v3834_v30 = vpop.eup %3833 }
0x1722   :  { %v3836_v31 = vpop.eup %3835  ;;  %v1761_v32 = vadd.f32 1.0, %v3834_v30 }
0x1723   :  { %v1760_v33 = vadd.f32 1.0, %v3836_v31 }
0x1724   :  { %3837 = vrcp.f32 %v1761_v32 }
0x1725   :  { %3839 = vrcp.f32 %v1760_v33 }
0x172e   :  { %v3838_v34 = vpop.eup %3837 }
0x172f   :  { %v3840_v36 = vpop.eup %3839  ;;  %v1769_v40 = vmul.f32 0.0, %v3838_v34 }
0x1730   :  { %v1768_v42 = vmul.f32 0.0, %v3840_v36 }
0x1792   :  { %v1775_v35 = vpop.permute.xlu1 %1774 }
0x1793   :  { %v1779_v37 = vmul.f32 %v3838_v34, %v1775_v35  ;;  %v1773_v38 = vpop.permute.xlu0 %1772 }
0x1794   :  { %v1778_v39 = vmul.f32 %v3840_v36, %v1773_v38 }
0x1795   :  { %1784 = vrot.lane.b32.xlu1 %v1779_v37, %s3955_s3 }
0x1796   :  { %1782 = vrot.lane.b32.xlu0 %v1778_v39, %s3955_s3 }
0x1807   :  { %v1785_v41 = vpop.permute.xlu1 %1784 }
0x1808   :  { %v1789_v43 = vadd.f32 %v1785_v41, %v1769_v40  ;;  %v1783_v44 = vpop.permute.xlu0 %1782 }
0x1809   :  { %v1788_v45 = vadd.f32 %v1783_v44, %v1768_v42 }
0x180a   :  { %3841 = vtanh.f32 %v1789_v43 }
0x180b   :  { %3843 = vtanh.f32 %v1788_v45 }
0x1814   :  { %v3842_v46 = vpop.eup %3841 }
0x1815   :  { %v3844_v48 = vpop.eup %3843  ;;  %1796 = vrot.lane.b32.xlu1 %v3842_v46, %s3954_s0 }
0x1816   :  { %1794 = vrot.lane.b32.xlu0 %v3844_v48, %s3954_s0 }
0x1887   :  { %v1797_v50 = vpop.permute.xlu1 %1796 }
0x1888   :  { %v1801_v29 = vmul.f32 %v3838_v34, %v1797_v50  ;;  %v1795_v51 = vpop.permute.xlu0 %1794 }
0x1889   :  { %v1800_v52 = vmul.f32 %v3840_v36, %v1795_v51 }
0x188a   :  { %1808 = vrot.lane.b32.xlu1 %v1801_v29, %s3955_s3 }
0x188b   :  { %1806 = vrot.lane.b32.xlu0 %v1800_v52, %s3955_s3 }
0x18fc   :  { %v1809_v54 = vpop.permute.xlu1 %1808 }
0x18fd   :  { %v1807_v53 = vpop.permute.xlu0 %1806 }
0x18fe   :  { %3370 = vmatprep.mubr.msk.f32.mxu1 %vm74_vm0, %v1807_v53 }
0x18ff   :  { %3371 = vmatmul.mubr.msk.f32.vlgmr.msra.gmra.mrb[2].mxu1 %vm74_vm0, %v1809_v54 }
0x1900   :  { %3568 = vmatpush3.bf16.msra.mxu1 %v4317_v49 }
0x1901   :  { %3570 = vmatprep.subr.bf16.mxu1 %v4322_v2 }
0x1904   :  { %3572 = vmatpush3.bf16.msra.mxu1 %v4322_v2 }
0x1905   :  { %3574 = vmatprep.subr.bf16.mxu1 %v4317_v49 }
0x19d2   :  { %v3372_v55 = vpop.f32.mrb[2].mxu1 }
0x19d3   :  { %v3649_v56 = vadd.f32 %v3372_v55, %v4348_v19  ;;  %v1880_v57 = vpop.f32.mrb[3].mxu1 }
0x19d4   :  { %v3650_v58 = vadd.f32 %v4348_v19, %v1880_v57 }
0x19d5   :  { %3845 = vtanh.f32 %v3649_v56  ;;  %v3020_v61 = vmul.f32 -1.442695, %v3649_v56 }
0x19d6   :  { %3847 = vtanh.f32 %v3650_v58  ;;  %v3019_v62 = vmul.f32 -1.442695, %v3650_v58 }
0x19d7   :  { %3849 = vpow2.f32 %v3020_v61 }
0x19d8   :  { %3851 = vpow2.f32 %v3019_v62 }
0x19df   :  { %v3846_v59 = vpop.eup %3845 }
0x19e0   :  { %v3848_v60 = vpop.eup %3847  ;;  %1911 = vrot.lane.b32.xlu1 %v3846_v59, %s3954_s0 }
0x19e1   :  { %1909 = vrot.lane.b32.xlu0 %v3848_v60, %s3954_s0  ;;  %v3850_v63 = vpop.eup %3849 }
0x19e2   :  { %v3852_v0 = vpop.eup %3851  ;;  %v1898_v9 = vadd.f32 1.0, %v3850_v63 }
0x19e3   :  { %v1897_v14 = vadd.f32 1.0, %v3852_v0 }
0x19e4   :  { %3853 = vrcp.f32 %v1898_v9 }
0x19e5   :  { %3855 = vrcp.f32 %v1897_v14 }
0x19ee   :  { %v3854_v47 = vpop.eup %3853 }
0x19ef   :  { %v3856_v3 = vpop.eup %3855  ;;  %v1906_v7 = vmul.f32 %v3854_v47, %v1789_v43 }
0x19f0   :  { %v1905_v10 = vmul.f32 %v3856_v3, %v1788_v45 }
0x1a52   :  { %v1912_v1 = vpop.permute.xlu1 %1911 }
0x1a53   :  { %v1916_v4 = vmul.f32 %v3854_v47, %v1912_v1  ;;  %v1910_v5 = vpop.permute.xlu0 %1909 }
0x1a54   :  { %v1915_v6 = vmul.f32 %v3856_v3, %v1910_v5 }
0x1a55   :  { %1921 = vrot.lane.b32.xlu1 %v1916_v4, %s3955_s3 }
0x1a56   :  { %1919 = vrot.lane.b32.xlu0 %v1915_v6, %s3955_s3 }
0x1ac7   :  { %v1922_v8 = vpop.permute.xlu1 %1921 }
0x1ac8   :  { %v1926_v11 = vadd.f32 %v1922_v8, %v1906_v7  ;;  %v1920_v12 = vpop.permute.xlu0 %1919 }
0x1ac9   :  { %v1925_v13 = vadd.f32 %v1920_v12, %v1905_v10 }
0x1aca   :  { %3857 = vtanh.f32 %v1926_v11 }
0x1acb   :  { %3859 = vtanh.f32 %v1925_v13 }
0x1ad4   :  { %v3858_v15 = vpop.eup %3857 }
0x1ad5   :  { %v3860_v16 = vpop.eup %3859  ;;  %1933 = vrot.lane.b32.xlu1 %v3858_v15, %s3954_s0 }
0x1ad6   :  { %1931 = vrot.lane.b32.xlu0 %v3860_v16, %s3954_s0 }
0x1b47   :  { %v1934_v17 = vpop.permute.xlu1 %1933 }
0x1b48   :  { %v1938_v18 = vmul.f32 %v3854_v47, %v1934_v17  ;;  %v1932_v20 = vpop.permute.xlu0 %1931 }
0x1b49   :  { %v1937_v21 = vmul.f32 %v3856_v3, %v1932_v20 }
0x1b4a   :  { %1945 = vrot.lane.b32.xlu1 %v1938_v18, %s3955_s3 }
0x1b4b   :  { %1943 = vrot.lane.b32.xlu0 %v1937_v21, %s3955_s3 }
0x1bbc   :  { %v1946_v23 = vpop.permute.xlu1 %1945 }
0x1bbd   :  { %v1944_v22 = vpop.permute.xlu0 %1943 }
0x1bbe   :  { %3381 = vmatprep.mubr.msk.f32.mxu1 %vm74_vm0, %v1944_v22 }
0x1bbf   :  { %3382 = vmatmul.mubr.msk.f32.vlgmr.msra.gmra.mrb[4].mxu1 %vm74_vm0, %v1946_v23 }
0x1bc0   :  { %3576 = vmatpush3.bf16.msra.mxu1 %v4317_v49 }
0x1bc1   :  { %3578 = vmatprep.subr.bf16.mxu1 %v4322_v2 }
0x1bc4   :  { %3580 = vmatpush3.bf16.msra.mxu1 %v4322_v2 }
0x1bc5   :  { %3582 = vmatprep.subr.bf16.mxu1 %v4317_v49 }
0x1c92   :  { %v3383_v24 = vpop.f32.mrb[4].mxu1 }
0x1c93   :  { %v3651_v25 = vadd.f32 %v3383_v24, %v4348_v19  ;;  %v2017_v26 = vpop.f32.mrb[5].mxu1 }
0x1c94   :  { %v3652_v27 = vadd.f32 %v4348_v19, %v2017_v26 }
0x1c95   :  { %3861 = vtanh.f32 %v3651_v25  ;;  %v3024_v32 = vmul.f32 -1.442695, %v3651_v25 }
0x1c96   :  { %3863 = vtanh.f32 %v3652_v27  ;;  %v3023_v33 = vmul.f32 -1.442695, %v3652_v27 }
0x1c97   :  { %3865 = vpow2.f32 %v3024_v32 }
0x1c98   :  { %3867 = vpow2.f32 %v3023_v33 }
0x1c9f   :  { %v3862_v30 = vpop.eup %3861 }
0x1ca0   :  { %v3864_v31 = vpop.eup %3863  ;;  %2048 = vrot.lane.b32.xlu1 %v3862_v30, %s3954_s0 }
0x1ca1   :  { %2046 = vrot.lane.b32.xlu0 %v3864_v31, %s3954_s0  ;;  %v3866_v34 = vpop.eup %3865 }
0x1ca2   :  { %v3868_v35 = vpop.eup %3867  ;;  %v2035_v36 = vadd.f32 1.0, %v3866_v34 }
0x1ca3   :  { %v2034_v37 = vadd.f32 1.0, %v3868_v35 }
0x1ca4   :  { %3869 = vrcp.f32 %v2035_v36 }
0x1ca5   :  { %3871 = vrcp.f32 %v2034_v37 }
0x1cae   :  { %v3870_v38 = vpop.eup %3869 }
0x1caf   :  { %v3872_v40 = vpop.eup %3871  ;;  %v2043_v44 = vmul.f32 %v3870_v38, %v1926_v11 }
0x1cb0   :  { %v2042_v46 = vmul.f32 %v3872_v40, %v1925_v13 }
0x1d12   :  { %v2049_v39 = vpop.permute.xlu1 %2048 }
0x1d13   :  { %v2053_v41 = vmul.f32 %v3870_v38, %v2049_v39  ;;  %v2047_v42 = vpop.permute.xlu0 %2046 }
0x1d14   :  { %v2052_v43 = vmul.f32 %v3872_v40, %v2047_v42 }
0x1d15   :  { %2058 = vrot.lane.b32.xlu1 %v2053_v41, %s3955_s3 }
0x1d16   :  { %2056 = vrot.lane.b32.xlu0 %v2052_v43, %s3955_s3 }
0x1d87   :  { %v2059_v45 = vpop.permute.xlu1 %2058 }
0x1d88   :  { %v2063_v48 = vadd.f32 %v2059_v45, %v2043_v44  ;;  %v2057_v50 = vpop.permute.xlu0 %2056 }
0x1d89   :  { %v2062_v29 = vadd.f32 %v2057_v50, %v2042_v46 }
0x1d8a   :  { %3873 = vtanh.f32 %v2063_v48 }
0x1d8b   :  { %3875 = vtanh.f32 %v2062_v29 }
0x1d94   :  { %v3874_v51 = vpop.eup %3873 }
0x1d95   :  { %v3876_v52 = vpop.eup %3875  ;;  %2070 = vrot.lane.b32.xlu1 %v3874_v51, %s3954_s0 }
0x1d96   :  { %2068 = vrot.lane.b32.xlu0 %v3876_v52, %s3954_s0 }
0x1e07   :  { %v2071_v53 = vpop.permute.xlu1 %2070 }
0x1e08   :  { %v2075_v54 = vmul.f32 %v3870_v38, %v2071_v53  ;;  %v2069_v55 = vpop.permute.xlu0 %2068 }
0x1e09   :  { %v2074_v56 = vmul.f32 %v3872_v40, %v2069_v55 }
0x1e0a   :  { %2082 = vrot.lane.b32.xlu1 %v2075_v54, %s3955_s3 }
0x1e0b   :  { %2080 = vrot.lane.b32.xlu0 %v2074_v56, %s3955_s3 }
0x1e7c   :  { %v2083_v58 = vpop.permute.xlu1 %2082 }
0x1e7d   :  { %v2081_v57 = vpop.permute.xlu0 %2080 }
0x1e7e   :  { %3392 = vmatprep.mubr.msk.f32.mxu1 %vm74_vm0, %v2081_v57 }
0x1e7f   :  { %3393 = vmatmul.mubr.msk.f32.vlgmr.msra.gmra.mrb[6].mxu1 %vm74_vm0, %v2083_v58 }
0x1e80   :  { %3584 = vmatpush3.bf16.msra.mxu1 %v4317_v49 }
0x1e81   :  { %3586 = vmatprep.subr.bf16.mxu1 %v4322_v2 }
0x1e84   :  { %3588 = vmatpush3.bf16.msra.mxu1 %v4322_v2 }
0x1e85   :  { %3590 = vmatprep.subr.bf16.mxu1 %v4317_v49 }
0x1f52   :  { %v3394_v59 = vpop.f32.mrb[6].mxu1 }
0x1f53   :  { %v3653_v60 = vadd.f32 %v3394_v59, %v4348_v19  ;;  %v2154_v61 = vpop.f32.mrb[7].mxu1 }
0x1f54   :  { %v3654_v62 = vadd.f32 %v4348_v19, %v2154_v61 }
0x1f55   :  { %3877 = vtanh.f32 %v3653_v60  ;;  %v3028_v9 = vmul.f32 -1.442695, %v3653_v60 }
0x1f56   :  { %3879 = vtanh.f32 %v3654_v62  ;;  %v3027_v14 = vmul.f32 -1.442695, %v3654_v62 }
0x1f57   :  { %3881 = vpow2.f32 %v3028_v9 }
0x1f58   :  { %3883 = vpow2.f32 %v3027_v14 }
0x1f5f   :  { %v3878_v63 = vpop.eup %3877 }
0x1f60   :  { %v3880_v0 = vpop.eup %3879  ;;  %2185 = vrot.lane.b32.xlu1 %v3878_v63, %s3954_s0 }
0x1f61   :  { %2183 = vrot.lane.b32.xlu0 %v3880_v0, %s3954_s0  ;;  %v3882_v47 = vpop.eup %3881 }
0x1f62   :  { %v3884_v1 = vpop.eup %3883  ;;  %v2172_v3 = vadd.f32 1.0, %v3882_v47 }
0x1f63   :  { %v2171_v4 = vadd.f32 1.0, %v3884_v1 }
0x1f64   :  { %3885 = vrcp.f32 %v2172_v3 }
0x1f65   :  { %3887 = vrcp.f32 %v2171_v4 }
0x1f6e   :  { %v3886_v5 = vpop.eup %3885 }
0x1f6f   :  { %v3888_v7 = vpop.eup %3887  ;;  %v2180_v12 = vmul.f32 %v3886_v5, %v2063_v48 }
0x1f70   :  { %v2179_v15 = vmul.f32 %v3888_v7, %v2062_v29 }
0x1fd2   :  { %v2186_v6 = vpop.permute.xlu1 %2185 }
0x1fd3   :  { %v2190_v8 = vmul.f32 %v3886_v5, %v2186_v6  ;;  %v2184_v10 = vpop.permute.xlu0 %2183 }
0x1fd4   :  { %v2189_v11 = vmul.f32 %v3888_v7, %v2184_v10 }
0x1fd5   :  { %2195 = vrot.lane.b32.xlu1 %v2190_v8, %s3955_s3 }
0x1fd6   :  { %2193 = vrot.lane.b32.xlu0 %v2189_v11, %s3955_s3 }
0x2047   :  { %v2196_v13 = vpop.permute.xlu1 %2195 }
0x2048   :  { %v2200_v16 = vadd.f32 %v2196_v13, %v2180_v12  ;;  %v2194_v17 = vpop.permute.xlu0 %2193 }
0x2049   :  { %v2199_v18 = vadd.f32 %v2194_v17, %v2179_v15 }
0x204a   :  { %3889 = vtanh.f32 %v2200_v16 }
0x204b   :  { %3891 = vtanh.f32 %v2199_v18 }
0x2054   :  { %v3890_v20 = vpop.eup %3889 }
0x2055   :  { %v3892_v21 = vpop.eup %3891  ;;  %2207 = vrot.lane.b32.xlu1 %v3890_v20, %s3954_s0 }
0x2056   :  { %2205 = vrot.lane.b32.xlu0 %v3892_v21, %s3954_s0 }
0x20c7   :  { %v2208_v22 = vpop.permute.xlu1 %2207 }
0x20c8   :  { %v2212_v23 = vmul.f32 %v3886_v5, %v2208_v22  ;;  %v2206_v24 = vpop.permute.xlu0 %2205 }
0x20c9   :  { %v2211_v25 = vmul.f32 %v3888_v7, %v2206_v24 }
0x20ca   :  { %2219 = vrot.lane.b32.xlu1 %v2212_v23, %s3955_s3 }
0x20cb   :  { %2217 = vrot.lane.b32.xlu0 %v2211_v25, %s3955_s3 }
0x213c   :  { %v2220_v27 = vpop.permute.xlu1 %2219 }
0x213d   :  { %v2218_v26 = vpop.permute.xlu0 %2217 }
0x213e   :  { %3403 = vmatprep.mubr.msk.f32.mxu1 %vm74_vm0, %v2218_v26 }
0x213f   :  { %3404 = vmatmul.mubr.msk.f32.vlgmr.msra.gmra.mrb[8].mxu1 %vm74_vm0, %v2220_v27 }
0x2140   :  { %3592 = vmatpush3.bf16.msra.mxu1 %v4317_v49 }
0x2141   :  { %3594 = vmatprep.subr.bf16.mxu1 %v4322_v2 }
0x2144   :  { %3596 = vmatpush3.bf16.msra.mxu1 %v4322_v2 }
0x2145   :  { %3598 = vmatprep.subr.bf16.mxu1 %v4317_v49 }
0x2212   :  { %v3405_v30 = vpop.f32.mrb[8].mxu1 }
0x2213   :  { %v3655_v31 = vadd.f32 %v3405_v30, %v4348_v19  ;;  %v2291_v32 = vpop.f32.mrb[9].mxu1 }
0x2214   :  { %v3656_v33 = vadd.f32 %v4348_v19, %v2291_v32 }
0x2215   :  { %3893 = vtanh.f32 %v3655_v31  ;;  %v3032_v36 = vmul.f32 -1.442695, %v3655_v31 }
0x2216   :  { %3895 = vtanh.f32 %v3656_v33  ;;  %v3031_v37 = vmul.f32 -1.442695, %v3656_v33 }
0x2217   :  { %3897 = vpow2.f32 %v3032_v36 }
0x2218   :  { %3899 = vpow2.f32 %v3031_v37 }
0x221f   :  { %v3894_v34 = vpop.eup %3893 }
0x2220   :  { %v3896_v35 = vpop.eup %3895  ;;  %2322 = vrot.lane.b32.xlu1 %v3894_v34, %s3954_s0 }
0x2221   :  { %2320 = vrot.lane.b32.xlu0 %v3896_v35, %s3954_s0  ;;  %v3898_v38 = vpop.eup %3897 }
0x2222   :  { %v3900_v39 = vpop.eup %3899  ;;  %v2309_v40 = vadd.f32 1.0, %v3898_v38 }
0x2223   :  { %v2308_v41 = vadd.f32 1.0, %v3900_v39 }
0x2224   :  { %3901 = vrcp.f32 %v2309_v40 }
0x2225   :  { %3903 = vrcp.f32 %v2308_v41 }
0x222e   :  { %v3902_v42 = vpop.eup %3901 }
0x222f   :  { %v3904_v44 = vpop.eup %3903  ;;  %v2317_v50 = vmul.f32 %v3902_v42, %v2200_v16 }
0x2230   :  { %v2316_v51 = vmul.f32 %v3904_v44, %v2199_v18 }
0x2292   :  { %v2323_v43 = vpop.permute.xlu1 %2322 }
0x2293   :  { %v2327_v45 = vmul.f32 %v3902_v42, %v2323_v43  ;;  %v2321_v46 = vpop.permute.xlu0 %2320 }
0x2294   :  { %v2326_v48 = vmul.f32 %v3904_v44, %v2321_v46 }
0x2295   :  { %2332 = vrot.lane.b32.xlu1 %v2327_v45, %s3955_s3 }
0x2296   :  { %2330 = vrot.lane.b32.xlu0 %v2326_v48, %s3955_s3 }
0x2307   :  { %v2333_v29 = vpop.permute.xlu1 %2332 }
0x2308   :  { %v2337_v52 = vadd.f32 %v2333_v29, %v2317_v50  ;;  %v2331_v53 = vpop.permute.xlu0 %2330 }
0x2309   :  { %v2336_v54 = vadd.f32 %v2331_v53, %v2316_v51 }
0x230a   :  { %3905 = vtanh.f32 %v2337_v52 }
0x230b   :  { %3907 = vtanh.f32 %v2336_v54 }
0x2314   :  { %v3906_v55 = vpop.eup %3905 }
0x2315   :  { %v3908_v56 = vpop.eup %3907  ;;  %2344 = vrot.lane.b32.xlu1 %v3906_v55, %s3954_s0 }
0x2316   :  { %2342 = vrot.lane.b32.xlu0 %v3908_v56, %s3954_s0 }
0x2387   :  { %v2345_v57 = vpop.permute.xlu1 %2344 }
0x2388   :  { %v2349_v58 = vmul.f32 %v3902_v42, %v2345_v57  ;;  %v2343_v59 = vpop.permute.xlu0 %2342 }
0x2389   :  { %v2348_v60 = vmul.f32 %v3904_v44, %v2343_v59 }
0x238a   :  { %2356 = vrot.lane.b32.xlu1 %v2349_v58, %s3955_s3 }
0x238b   :  { %2354 = vrot.lane.b32.xlu0 %v2348_v60, %s3955_s3 }
0x23fc   :  { %v2357_v62 = vpop.permute.xlu1 %2356 }
0x23fd   :  { %v2355_v61 = vpop.permute.xlu0 %2354 }
0x23fe   :  { %3414 = vmatprep.mubr.msk.f32.mxu1 %vm74_vm0, %v2355_v61 }
0x23ff   :  { %3415 = vmatmul.mubr.msk.f32.vlgmr.msra.gmra.mrb[10].mxu1 %vm74_vm0, %v2357_v62 }
0x2400   :  { %3600 = vmatpush3.bf16.msra.mxu1 %v4317_v49 }
0x2401   :  { %3602 = vmatprep.subr.bf16.mxu1 %v4322_v2 }
0x2404   :  { %3604 = vmatpush3.bf16.msra.mxu1 %v4322_v2 }
0x2405   :  { %3606 = vmatprep.subr.bf16.mxu1 %v4317_v49 }
0x24d2   :  { %v3416_v63 = vpop.f32.mrb[10].mxu1 }
0x24d3   :  { %v3657_v0 = vadd.f32 %v3416_v63, %v4348_v19  ;;  %v2428_v9 = vpop.f32.mrb[11].mxu1 }
0x24d4   :  { %v3658_v14 = vadd.f32 %v4348_v19, %v2428_v9 }
0x24d5   :  { %3909 = vtanh.f32 %v3657_v0  ;;  %v3036_v3 = vmul.f32 -1.442695, %v3657_v0 }
0x24d6   :  { %3911 = vtanh.f32 %v3658_v14  ;;  %v3035_v4 = vmul.f32 -1.442695, %v3658_v14 }
0x24d7   :  { %3913 = vpow2.f32 %v3036_v3 }
0x24d8   :  { %3915 = vpow2.f32 %v3035_v4 }
0x24df   :  { %v3910_v47 = vpop.eup %3909 }
0x24e0   :  { %v3912_v1 = vpop.eup %3911  ;;  %2459 = vrot.lane.b32.xlu1 %v3910_v47, %s3954_s0 }
0x24e1   :  { %2457 = vrot.lane.b32.xlu0 %v3912_v1, %s3954_s0  ;;  %v3914_v5 = vpop.eup %3913 }
0x24e2   :  { %v3916_v6 = vpop.eup %3915  ;;  %v2446_v7 = vadd.f32 1.0, %v3914_v5 }
0x24e3   :  { %v2445_v8 = vadd.f32 1.0, %v3916_v6 }
0x24e4   :  { %3917 = vrcp.f32 %v2446_v7 }
0x24e5   :  { %3919 = vrcp.f32 %v2445_v8 }
0x24ee   :  { %v3918_v10 = vpop.eup %3917 }
0x24ef   :  { %v3920_v12 = vpop.eup %3919  ;;  %v2454_v17 = vmul.f32 %v3918_v10, %v2337_v52 }
0x24f0   :  { %v2453_v20 = vmul.f32 %v3920_v12, %v2336_v54 }
0x2552   :  { %v2460_v11 = vpop.permute.xlu1 %2459 }
0x2553   :  { %v2464_v13 = vmul.f32 %v3918_v10, %v2460_v11  ;;  %v2458_v15 = vpop.permute.xlu0 %2457 }
0x2554   :  { %v2463_v16 = vmul.f32 %v3920_v12, %v2458_v15 }
0x2555   :  { %2469 = vrot.lane.b32.xlu1 %v2464_v13, %s3955_s3 }
0x2556   :  { %2467 = vrot.lane.b32.xlu0 %v2463_v16, %s3955_s3 }
0x25c7   :  { %v2470_v18 = vpop.permute.xlu1 %2469 }
0x25c8   :  { %v4436_v21 = vadd.f32 %v2470_v18, %v2454_v17  ;;  %v2468_v22 = vpop.permute.xlu0 %2467  ;;  %v3956_v17 = vmov 0.0|0.0   ;;  %v2773_v18 = vld [vmem:[%s4537_s7 + $0x8] sm:$0xff] }
0x25c9   :  { %v4438_v23 = vadd.f32 %v2468_v22, %v2453_v20  ;;  %3613 = vmatprep.subr.bf16.mxu0 %v3956_v17  ;;  %v2774_v20 = vld [vmem:[%s4537_s7 + $0x10] sm:$0xff] }
0x25ca   :  { %3921 = vtanh.f32 %v4436_v21 }
0x25cb   :  { %3923 = vtanh.f32 %v4438_v23 }
0x25d4   :  { %v3922_v24 = vpop.eup %3921 }
0x25d5   :  { %v3924_v25 = vpop.eup %3923  ;;  %2481 = vrot.lane.b32.xlu1 %v3922_v24, %s3954_s0  ;;  %v2775_v24 = vld [vmem:[%s4537_s7 + $0x18] sm:$0xff] }
0x25d6   :  { %2479 = vrot.lane.b32.xlu0 %v3924_v25, %s3954_s0  ;;  %v3617_v25 = vpack.c.bf16 %v2775_v24, %v2774_v20 }
0x2647   :  { %v2482_v26 = vpop.permute.xlu1 %2481 }
0x2648   :  { %v2486_v27 = vmul.f32 %v3918_v10, %v2482_v26  ;;  %v2480_v30 = vpop.permute.xlu0 %2479 }
0x2649   :  { %v2485_v31 = vmul.f32 %v3920_v12, %v2480_v30  ;;  %v2776_v30 = vld [vmem:[%s4537_s7 + $0x20] sm:$0xff] }
0x264a   :  { %2493 = vrot.lane.b32.xlu1 %v2486_v27, %s3955_s3 }
0x264b   :  { %2491 = vrot.lane.b32.xlu0 %v2485_v31, %s3955_s3  ;;  %v2632_v62 = vmul.f32 0.0, %v2485_v31  ;;  %v2777_v31 = vld [vmem:[%s4537_s7 + $0x28] sm:$0xff] }
0x26bc   :  { %v2494_v33 = vpop.permute.xlu1 %2493 }
0x26bd   :  { %v2492_v32 = vpop.permute.xlu0 %2491 }
0x26be   :  { %3425 = vmatprep.mubr.msk.f32.mxu1 %vm74_vm0, %v2492_v32 }
0x26bf   :  { %3426 = vmatmul.mubr.msk.f32.vlgmr.msra.gmra.mrb[12].mxu1 %vm74_vm0, %v2494_v33 }
0x26c0   :  { %3608 = vmatpush3.bf16.msra.mxu1 %v4317_v49 }
0x26c1   :  { %3610 = vmatprep.subr.bf16.mxu1 %v4322_v2 }
0x26c4   :  { %3612 = vmatpush3.bf16.msra.mxu1 %v4322_v2 }
0x26c5   :  { %3625 = vmatprep.subr.bf16.mxu1 %v3956_v17 }
0x2792   :  { %v3427_v34 = vpop.f32.mrb[12].mxu1 }
0x2793   :  { %v3659_v35 = vadd.f32 %v3427_v34, %v4348_v19  ;;  %v2565_v36 = vpop.f32.mrb[13].mxu1 }
0x2794   :  { %v3660_v37 = vadd.f32 %v4348_v19, %v2565_v36  ;;  %v3620_v36 = vpack.c.bf16 %v2777_v31, %v2776_v30 }
0x2795   :  { %3925 = vtanh.f32 %v3659_v35  ;;  %v3040_v40 = vmul.f32 -1.442695, %v3659_v35 }
0x2796   :  { %3927 = vtanh.f32 %v3660_v37  ;;  %v3039_v49 = vmul.f32 -1.442695, %v3660_v37  ;;  %v2778_v37 = vld [vmem:[%s4537_s7 + $0x30] sm:$0xff] }
0x2797   :  { %3929 = vpow2.f32 %v3040_v40  ;;  %v2862_v40 = vld [vmem:[%s4538_s9] sm:$0xff] }
0x2798   :  { %3931 = vpow2.f32 %v3039_v49  ;;  %v2863_v49 = vld [vmem:[%s4538_s9 + $0x8] sm:$0xff] }
0x279f   :  { %v3926_v38 = vpop.eup %3925 }
0x27a0   :  { %v3928_v39 = vpop.eup %3927  ;;  %2596 = vrot.lane.b32.xlu0 %v3926_v38, %s3954_s0  ;;  %v2779_v38 = vld [vmem:[%s4537_s7 + $0x38] sm:$0xff] }
0x27a1   :  { %2594 = vrot.lane.b32.xlu1 %v3928_v39, %s3954_s0  ;;  %v3930_v41 = vpop.eup %3929  ;;  %v3623_v39 = vpack.c.bf16 %v2779_v38, %v2778_v37 }
0x27a2   :  { %v3932_v2 = vpop.eup %3931  ;;  %v2583_v42 = vadd.f32 1.0, %v3930_v41  ;;  %v2626_v41 = vmul.f32 0.0, %v4438_v23 }
0x27a3   :  { %v2582_v43 = vadd.f32 1.0, %v3932_v2  ;;  %v3626_v2 = vpack.c.bf16 %v2863_v49, %v2862_v40 }
0x27a4   :  { %3933 = vrcp.f32 %v2583_v42 }
0x27a5   :  { %3935 = vrcp.f32 %v2582_v43 }
0x27ae   :  { %v3934_v44 = vpop.eup %3933 }
0x27af   :  { %v3936_v46 = vpop.eup %3935  ;;  %v2591_v51 = vmul.f32 %v3934_v44, %v4436_v21 }
0x27b0   :  { %v2590_v53 = vmul.f32 %v3936_v46, %v4438_v23 }
0x2812   :  { %v2597_v45 = vpop.permute.xlu0 %2596 }
0x2813   :  { %v2601_v48 = vmul.f32 %v3934_v44, %v2597_v45  ;;  %v2595_v50 = vpop.permute.xlu1 %2594 }
0x2814   :  { %v2600_v29 = vmul.f32 %v3936_v46, %v2595_v50 }
0x2815   :  { %2606 = vrot.lane.b32.xlu0 %v2601_v48, %s3955_s3 }
0x2816   :  { %2604 = vrot.lane.b32.xlu1 %v2600_v29, %s3955_s3 }
0x2887   :  { %v2607_v52 = vpop.permute.xlu0 %2606 }
0x2888   :  { %v4459_v54 = vadd.f32 %v2607_v52, %v2591_v51  ;;  %v2605_v55 = vpop.permute.xlu1 %2604 }
0x2889   :  { %v4461_v56 = vadd.f32 %v2605_v55, %v2590_v53 }
0x288a   :  { %3937 = vtanh.f32 %v4459_v54  ;;  %v2625_v48 = vmul.f32 0.0, %v4459_v54  ;;  %v2865_v54 = vld [vmem:[%s4538_s9 + $0x18] sm:$0xff] }
0x288b   :  { %3939 = vtanh.f32 %v4461_v56  ;;  %v2628_v42 = vadd.f32 %v2626_v41, %v4461_v56 }
0x288c   :  { %v2629_v50 = vadd.f32 %v2625_v48, %v4436_v21  ;;  %v3045_v21 = vld [vmem:[%s4539_s8] ss:$0 sm:$0xff] }
0x288d   :  { %v2763_v45 = vmul.f32 0.0, %v2628_v42 }
0x2894   :  { %v3938_v57 = vpop.eup %3937 }
0x2895   :  { %v3940_v58 = vpop.eup %3939  ;;  %2618 = vrot.lane.b32.xlu0 %v3938_v57, %s3954_s0  ;;  %v2864_v57 = vld [vmem:[%s4538_s9 + $0x10] sm:$0xff] }
0x2896   :  { %2616 = vrot.lane.b32.xlu1 %v3940_v58, %s3954_s0  ;;  %v3629_v58 = vpack.c.bf16 %v2865_v54, %v2864_v57 }
0x2907   :  { %v2619_v59 = vpop.permute.xlu0 %2618 }
0x2908   :  { %v2623_v60 = vmul.f32 %v3934_v44, %v2619_v59  ;;  %v2617_v61 = vpop.permute.xlu1 %2616 }
0x2909   :  { %v2622_v63 = vmul.f32 %v3936_v46, %v2617_v61 }
0x290a   :  { %v2631_v0 = vmul.f32 0.0, %v2623_v60 }
0x290b   :  { %v2634_v9 = vadd.f32 %v2632_v62, %v2622_v63  ;;  %v3047_v63 = vld [vmem:[%s4540_s10] ss:$0 sm:$0xff] }
0x290c   :  { %v2635_v14 = vadd.f32 %v2631_v0, %v2486_v27 }
0x290d   :  { %2640 = vrot.lane.b32.xlu0 %v2634_v9, %s3955_s3 }
0x290e   :  { %2642 = vrot.lane.b32.xlu1 %v2635_v14, %s3955_s3 }
0x297f   :  { %v2641_v47 = vpop.permute.xlu0 %2640 }
0x2980   :  { %v2643_v1 = vpop.permute.xlu1 %2642  ;;  %3436 = vmatprep.mubr.msk.f32.mxu1 %vm74_vm0, %v2641_v47 }
0x2981   :  { %3437 = vmatmul.mubr.msk.f32.vlgmr.msra.gmra.mrb[14].mxu1 %vm74_vm0, %v2643_v1 }
0x2982   :  { %3466 = vmatprep.mubr.msk.f32.mxu1 %vm3957_vm1, %v3953_v28  ;;  %3627 = vmatpush3.bf16.msra.mxu1 %v3626_v2 }
0x2983   :  { %3628 = vmatprep.subr.bf16.mxu1 %v3956_v17 }
0x2986   :  { %3630 = vmatpush3.bf16.msra.mxu1 %v3629_v58 }
0x2a54   :  { %v3438_v3 = vpop.f32.mrb[14].mxu1 }
0x2a55   :  { %v3661_v4 = vadd.f32 %v3438_v3, %v4348_v19  ;;  %v2714_v5 = vpop.f32.mrb[15].mxu1 }
0x2a56   :  { %v3662_v6 = vadd.f32 %v4348_v19, %v2714_v5  ;;  %v2772_v19 = vld [vmem:[%s4537_s7] sm:$0xff]  ;;  %s3958_s7 = smov 96  }
0x2a57   :  { %3941 = vtanh.f32 %v3661_v4  ;;  %v3044_v10 = vmul.f32 -1.442695, %v3661_v4  ;;  %v3614_v22 = vpack.c.bf16 %v2773_v18, %v2772_v19 }
0x2a58   :  { %3943 = vtanh.f32 %v3662_v6  ;;  %v3043_v11 = vmul.f32 -1.442695, %v3662_v6 }
0x2a59   :  { %3945 = vpow2.f32 %v3044_v10  ;;  %3615 = vmatpush3.bf16.msra.mxu0 %v3614_v22 }
0x2a5a   :  { %3947 = vpow2.f32 %v3043_v11  ;;  %3616 = vmatprep.subr.bf16.mxu0 %v3956_v17 }
0x2a5d   :  { %3618 = vmatpush3.bf16.msra.mxu0 %v3617_v25 }
0x2a5e   :  { %3619 = vmatprep.subr.bf16.mxu0 %v3956_v17 }
0x2a61   :  { %v3942_v7 = vpop.eup %3941  ;;  %3621 = vmatpush3.bf16.msra.mxu0 %v3620_v36 }
0x2a62   :  { %v3944_v8 = vpop.eup %3943  ;;  %2745 = vrot.lane.b32.xlu1 %v3942_v7, %s3954_s0  ;;  %3622 = vmatprep.subr.bf16.mxu0 %v3956_v17 }
0x2a63   :  { %2743 = vrot.lane.b32.xlu0 %v3944_v8, %s3954_s0  ;;  %v3946_v12 = vpop.eup %3945 }
0x2a64   :  { %v3948_v13 = vpop.eup %3947  ;;  %v2732_v15 = vadd.f32 1.0, %v3946_v12 }
0x2a65   :  { %v2731_v16 = vadd.f32 1.0, %v3948_v13  ;;  %3624 = vmatpush3.bf16.msra.mxu0 %v3623_v39 }
0x2a66   :  { %3949 = vrcp.f32 %v2732_v15 }
0x2a67   :  { %3951 = vrcp.f32 %v2731_v16 }
0x2a70   :  { %v3950_v26 = vpop.eup %3949 }
0x2a71   :  { %v3952_v32 = vpop.eup %3951  ;;  %v2740_v51 = vmul.f32 %v3950_v26, %v2629_v50 }
0x2a72   :  { %v2739_v43 = vmul.f32 %v3952_v32, %v2628_v42 }
0x2ad4   :  { %v2746_v27 = vpop.permute.xlu1 %2745 }
0x2ad5   :  { %v2750_v33 = vmul.f32 %v3950_v26, %v2746_v27  ;;  %v2744_v34 = vpop.permute.xlu0 %2743 }
0x2ad6   :  { %v2749_v35 = vmul.f32 %v3952_v32, %v2744_v34 }
0x2ad7   :  { %2755 = vrot.lane.b32.xlu1 %v2750_v33, %s3955_s3 }
0x2ad8   :  { %2753 = vrot.lane.b32.xlu0 %v2749_v35, %s3955_s3 }
0x2b49   :  { %v2756_v29 = vpop.permute.xlu1 %2755 }
0x2b4a   :  { %v2754_v44 = vpop.permute.xlu0 %2753  ;;  %v2760_v52 = vadd.f32 %v2756_v29, %v2740_v51 }
0x2b4b   :  { %v2759_v46 = vadd.f32 %v2754_v44, %v2739_v43 }
0x2b4c   :  { %v2762_v23 = vmul.f32 0.0, %v2760_v52 }
0x2b4d   :  { %v2765_v28 = vadd.f32 %v2763_v45, %v2759_v46 }
0x2b4e   :  { %v2766_v53 = vadd.f32 %v2762_v23, %v2629_v50 }
0x2b4f   :  { %2768 = vrot.lane.b32.xlu0 %v2765_v28, %s3958_s7 }
0x2bc1   :  { %v2769_v55 = vpop.permute.xlu0 %2768 }
0x2bc2   :  { %v2771_v56 = vsel %vm74_vm0, %v2769_v55, %v2766_v53 }
0x2bc3   :  { %3456 = vmatmul.mubr.msk.f32.vlgmr.msra.gmra.mrb[16].mxu0 %vm2787_vm2, %v2771_v56 }
0x2c96   :  { %v2857_v59 = vpop.f32.mrb[16].mxu0 }
0x2c97   :  { %v2858_v60 = vadd.f32 %v3045_v21, %v2857_v59  ;;  %v3457_v61 = vpop.f32.mrb[17].mxu0 }
0x2c99   :  { %v2861_v62 = vmax.f32 %v2858_v60, 0.0 }
0x2c9b   :  { %3467 = vmatmul.mubr.msk.f32.vlgmr.msra.gmra.mrb[16].mxu1 %vm74_vm0, %v2861_v62 }
0x2d6e   :  { %v2942_v0 = vpop.f32.mrb[16].mxu1 }
0x2d6f   :  { %v2943_v9 = vadd.f32 %v3047_v63, %v2942_v0  ;;  %v3468_v14 = vpop.f32.mrb[17].mxu1 }
0x2d71   :  { %2946 = vst [vmem:[%s4541_s11] sm:$0xff] %v2943_v9 }

</bundles_post_ra>
